<compile_context>
chip_gen: v6e
topology: v6e:2x2x1
jax: 0.10.0
libtpu: 0.0.40
codegen_flags: <defaults>
</compile_context>

<pallas_src>
import math

import jax
import jax.numpy as jnp
from jax import lax
from jax.experimental import pallas as pl
from jax.experimental.pallas import tpu as pltpu

LEAKY_SLOPE = 0.01     # F.leaky_relu default negative_slope
N_LOSS = 3             # ffvae_cost, disc_cost, main_cost packed in one output


def _leaky_relu(x):
    return jnp.where(x >= 0, x, LEAKY_SLOPE * x)


def _pad_cols(x, width):
    b, w = x.shape
    if w == width:
        return x
    return jnp.concatenate([x, jnp.zeros((b, width - w), jnp.float32)], axis=1)


def make_ffvae_kernel(*, B, W, input_dim, zdim, num_classes,
                      n_enc, n_dec, n_disc, n_clf, gamma, alpha):
    """W = lane-aligned padded feature width shared by every packed MLP layer."""

    def _mlp(L, w_ref, b_ref, n_layers):
        # PyTorch `MLP`: leaky_relu after EVERY layer (including the last one).
        for l in range(n_layers):
            L = jnp.dot(L, w_ref[l], preferred_element_type=jnp.float32) + b_ref[l]
            L = _leaky_relu(L)
        return L

    def kernel(perm1_ref, perm2_ref, x_ref, aux_ref,
               we_ref, be_ref, wd_ref, bd_ref, wa_ref, ba_ref, wc_ref, bc_ref,
               pre_ref, loss_ref, zb_sc, zf1_sc, zf2_sc):
        # ---- inputs (one lane-dense slab each) ----
        x_pad = (x_ref[...] + 1.0) * 0.5      # padded cols -> 0.5, hit zero weight rows
        aux = aux_ref[...]
        attrs = aux[:, 0:1]
        randcol = aux[:, 1:2]
        onehot = aux[:, 2:2 + num_classes]
        eps = aux[:, 2 + num_classes:2 + num_classes + zdim]

        # ---------------- encoder ----------------
        stats = _mlp(x_pad, we_ref, be_ref, n_enc)          # [B, W]
        mu = stats[:, :zdim]                                 # [B, zdim]
        logvar = stats[:, zdim:2 * zdim]                     # [B, zdim]

        col = lax.broadcasted_iota(jnp.int32, (1, zdim), 1)
        sens_mask = col == 0                                  # sens_idx = [0]
        nonsens_mask = (col >= 1) & (col < zdim // 2)         # nonsens_idx = [1..zdim//2-1]

        std = jnp.exp(0.5 * logvar)                           # single exp; std*std reused in KL
        z = mu + std * eps                                    # eps zero outside nonsens cols
        zeros_bz = jnp.zeros_like(mu)
        zb = jnp.where(sens_mask, mu, jnp.where(nonsens_mask, z, zeros_bz))
        zb_w = _pad_cols(zb, W)                               # [B, W]

        # ---- z_fake via O(B) row gather (replaces the BxB permutation matmuls) ----
        zb_sc[...] = zb_w

        def gather_body(i, carry):
            p1 = perm1_ref[i]
            p2 = perm2_ref[i]
            zf1_sc[pl.ds(i, 1), :] = zb_sc[pl.ds(p1, 1), :]
            zf2_sc[pl.ds(i, 1), :] = zb_sc[pl.ds(p2, 1), :]
            return carry

        lax.fori_loop(0, B, gather_body, 0)

        col_w = lax.broadcasted_iota(jnp.int32, (1, W), 1)
        # z_fake[:,0] = zb[perm1,0]; z_fake[:,1:] = zb[perm2,1:]  (padded cols stay 0)
        z_fake = jnp.where(col_w == 0, zf1_sc[...], zf2_sc[...])   # [B, W]

        # ---------------- decoder / ELBO ----------------
        xIz = _mlp(zb_w, wd_ref, bd_ref, n_dec)               # [B, W]
        diff = x_pad[:, :input_dim] - xIz[:, :input_dim]
        logp = -0.5 * diff * diff - 0.5 * math.log(2.0 * math.pi)
        recon = jnp.sum(logp, axis=1, keepdims=True)          # [B, 1]

        kl_elem = -0.5 * logvar + 0.5 * (std * std + mu * mu) - 0.5
        kl = jnp.sum(jnp.where(nonsens_mask, kl_elem, zeros_bz), axis=1, keepdims=True)
        elbo_mean = jnp.sum(recon - kl, axis=0, keepdims=True) / B     # [1, 1]

        # BCEWithLogits(b_logits, attrs), mean over batch
        b_logits = mu[:, 0:1]
        bce = (jnp.maximum(b_logits, 0.0) - b_logits * attrs
               + jnp.log(1.0 + jnp.exp(-jnp.abs(b_logits))))
        clf_mean = jnp.sum(bce, axis=0, keepdims=True) / B

        # ---- discriminator: both passes fused into one [2B, W] matmul chain ----
        d_in = jnp.concatenate([zb_w, z_fake], axis=0)        # [2B, W]
        d_out = _mlp(d_in, wa_ref, ba_ref, n_disc)            # [2B, W]
        logits = d_out[:B, :2]
        logits_prime = d_out[B:, :2]

        tc_mean = jnp.sum(logits[:, 0:1] - logits[:, 1:2], axis=0, keepdims=True) / B
        ffvae_cost = -1.0 * elbo_mean + gamma * tc_mean + alpha * clf_mean

        def ce_mean(lg, cls):
            m = jnp.max(lg, axis=1, keepdims=True)
            lse = m + jnp.log(jnp.sum(jnp.exp(lg - m), axis=1, keepdims=True))
            return jnp.sum(lse - lg[:, cls:cls + 1], axis=0, keepdims=True) / B

        disc_cost = 0.5 * (ce_mean(logits, 0) + ce_mean(logits_prime, 1))

        # ---------------- classifier ----------------
        encoded_x = jnp.where(sens_mask, randcol, mu)          # col 0 <- fresh gaussian noise
        clf_out = _mlp(_pad_cols(encoded_x, W), wc_ref, bc_ref, n_clf)   # [B, W]
        ps = clf_out[:, :num_classes]
        m = jnp.max(ps, axis=1, keepdims=True)
        lse = m + jnp.log(jnp.sum(jnp.exp(ps - m), axis=1, keepdims=True))
        nll = -jnp.sum(onehot * (ps - lse), axis=1, keepdims=True)       # [B, 1]
        class_loss = jnp.sum(nll, axis=0, keepdims=True) / B             # [1, 1]

        # ---------------- outputs ----------------
        # clf_out cols >= num_classes are exactly 0 (zero-padded weights/bias), so the
        # full slab IS pre_softmax padded to a lane-dense width.
        pre_ref[...] = clf_out
        loss_ref[0:1, 0:1] = ffvae_cost
        loss_ref[0:1, 1:2] = disc_cost
        loss_ref[0:1, 2:3] = class_loss

    return kernel


def _pack_mlp(params, width):
    """Stack zero-padded [in,out] weights / [1,out] biases into [L,W,W] / [L,1,W]."""
    n_layers = len(params)
    wbuf = jnp.zeros((n_layers, width, width), jnp.float32)
    bbuf = jnp.zeros((n_layers, 1, width), jnp.float32)
    for l, (w, b) in enumerate(params):
        wbuf = wbuf.at[l, :w.shape[0], :w.shape[1]].set(w)
        bbuf = bbuf.at[l, :, :b.shape[1]].set(b)
    return wbuf, bbuf


def ffvae_forward(inputs, attrs, onehot, eps_full, randcol, perm1, perm2,
                  enc_p, dec_p, disc_p, clf_p, *, zdim, gamma, alpha, num_classes):
    B, input_dim = inputs.shape

    sizes = []
    for ps in (enc_p, dec_p, disc_p, clf_p):
        for w, _ in ps:
            sizes += [w.shape[0], w.shape[1]]
    W = ((max(sizes) + 127) // 128) * 128      # lane-aligned padded width for every layer

    we, be = _pack_mlp(enc_p, W)
    wd, bd = _pack_mlp(dec_p, W)
    wa, ba = _pack_mlp(disc_p, W)
    wc, bc = _pack_mlp(clf_p, W)

    x_pad = jnp.zeros((B, W), jnp.float32).at[:, :input_dim].set(inputs)
    aux = jnp.concatenate([attrs, randcol, onehot, eps_full], axis=1)   # [B, 2+C+zdim]

    kernel = make_ffvae_kernel(
        B=B, W=W, input_dim=input_dim, zdim=zdim, num_classes=num_classes,
        n_enc=len(enc_p), n_dec=len(dec_p), n_disc=len(disc_p), n_clf=len(clf_p),
        gamma=float(gamma), alpha=float(alpha))

    smem = pltpu.MemorySpace.SMEM
    vmem = pltpu.MemorySpace.VMEM
    args = (perm1.astype(jnp.int32), perm2.astype(jnp.int32), x_pad, aux,
            we, be, wd, bd, wa, ba, wc, bc)
    in_specs = ([pl.BlockSpec(memory_space=smem)] * 2
                + [pl.BlockSpec(memory_space=vmem)] * (len(args) - 2))
    out_shape = (jax.ShapeDtypeStruct((B, W), jnp.float32),       # lane-dense pre_softmax slab
                 jax.ShapeDtypeStruct((1, N_LOSS), jnp.float32))  # packed scalar losses
    out_specs = (pl.BlockSpec(memory_space=vmem), pl.BlockSpec(memory_space=vmem))

    pre_slab, losses = pl.pallas_call(
        kernel,
        out_shape=out_shape,
        in_specs=in_specs,
        out_specs=out_specs,
        scratch_shapes=[pltpu.VMEM((B, W), jnp.float32)] * 3,     # zb, zf1, zf2
        compiler_params=pltpu.CompilerParams(vmem_limit_bytes=32 * 1024 * 1024),
    )(*args)

    pre_softmax = pre_slab[:, :num_classes]
    cost_dict = dict(ffvae_cost=losses[0, 0], disc_cost=losses[0, 1],
                     main_cost=losses[0, 2])
    return pre_softmax, cost_dict


# ---------------- pure-JAX reference (for a correctness check) ----------------

def _ref_mlp(L, params):
    for w, b in params:
        L = jnp.dot(L, w, precision=lax.Precision.HIGHEST) + b
        L = jnp.where(L >= 0, L, LEAKY_SLOPE * L)
    return L


def ffvae_reference(inputs, attrs, onehot, eps_full, randcol, perm1, perm2,
                    enc_p, dec_p, disc_p, clf_p, *, zdim, gamma, alpha):
    x = (inputs + 1.0) / 2.0
    stats = _ref_mlp(x, enc_p)
    _mu, _logvar = stats[:, :zdim], stats[:, zdim:2 * zdim]
    mu_ns = _mu[:, 1:zdim // 2]
    logvar_ns = _logvar[:, 1:zdim // 2]
    std_ns = jnp.exp(logvar_ns / 2.0)
    z = mu_ns + std_ns * eps_full[:, 1:zdim // 2]
    zb = jnp.zeros_like(_mu)
    zb = zb.at[:, 0].set(_mu[:, 0])
    zb = zb.at[:, 1:zdim // 2].set(z)
    xIz = _ref_mlp(zb, dec_p)
    logp = -0.5 * (x - xIz) ** 2 - 0.5 * math.log(2.0 * math.pi)
    recon = logp.sum(axis=1)
    kl = (-0.5 * logvar_ns + 0.5 * (jnp.exp(logvar_ns) + mu_ns ** 2) - 0.5).sum(axis=1)
    elbo = recon - kl
    b_logits = _mu[:, 0:1]
    bce = (jnp.maximum(b_logits, 0.0) - b_logits * attrs
           + jnp.log1p(jnp.exp(-jnp.abs(b_logits))))
    logits = _ref_mlp(zb, disc_p)
    total_corr = logits[:, 0] - logits[:, 1]
    ffvae_cost = -1.0 * elbo.mean() + gamma * total_corr.mean() + alpha * bce.mean()
    z_fake = jnp.zeros_like(zb)
    z_fake = z_fake.at[:, 0].set(zb[perm1, 0])
    z_fake = z_fake.at[:, 1:].set(zb[perm2, 1:])
    logits_p = _ref_mlp(z_fake, disc_p)

    def ce(lg, cls):
        lse = jax.nn.logsumexp(lg, axis=1)
        return (lse - lg[:, cls]).mean()

    disc_cost = 0.5 * (ce(logits, 0) + ce(logits_p, 1))
    encoded_x = _mu.at[:, 0].set(randcol[:, 0])
    pre = _ref_mlp(encoded_x, clf_p)
    logprobs = jax.nn.log_softmax(pre, axis=1)
    main_cost = -(onehot * logprobs).sum(axis=1).mean()
    return pre, ffvae_cost, disc_cost, main_cost


# ---------------- deterministic parameter / input construction ----------------

def xavier_uniform(key, shape):
    fan_in, fan_out = shape
    limit = math.sqrt(6.0 / (fan_in + fan_out))
    return jax.random.uniform(key, shape, jnp.float32, -limit, limit)


def init_mlp(key, sizes):
    params = []
    for i in range(len(sizes) - 1):
        key, kw, kb = jax.random.split(key, 3)
        w = xavier_uniform(kw, (sizes[i], sizes[i + 1]))
        bound = 1.0 / math.sqrt(sizes[i])
        b = jax.random.uniform(kb, (1, sizes[i + 1]), jnp.float32, -bound, bound)
        params.append((w, b))
    return params, key


if __name__ == "__main__":
    # small config consistent with the module's __init__ (tabular / MLP branch)
    B, input_dim, zdim, num_classes = 8, 16, 8, 2
    edepth = adepth = cdepth = 2
    ewidths = awidths = cwidths = 32
    gamma, alpha = 10.0, 1.0

    key = jax.random.PRNGKey(0)

    enc_sizes = [input_dim] + edepth * [ewidths] + [2 * zdim]
    dec_sizes = [zdim] + edepth * [ewidths] + [input_dim]
    adv_sizes = [zdim] + adepth * [awidths] + [2]
    cls_sizes = [zdim] + cdepth * [cwidths] + [num_classes]

    enc_p, key = init_mlp(key, enc_sizes)
    dec_p, key = init_mlp(key, dec_sizes)
    disc_p, key = init_mlp(key, adv_sizes)
    clf_p, key = init_mlp(key, cls_sizes)

    key, k1, k2, k3, k4, k5, k6, k7 = jax.random.split(key, 8)
    inputs = jax.random.normal(k1, (B, input_dim), jnp.float32)
    labels = jax.random.randint(k2, (B,), 0, num_classes)
    onehot = jax.nn.one_hot(labels, num_classes, dtype=jnp.float32)
    attrs = jax.random.bernoulli(k3, 0.5, (B, 1)).astype(jnp.float32)

    # eps for the reparameterised sample (only nonsensitive columns 1..zdim//2-1 used)
    eps_full = jnp.zeros((B, zdim), jnp.float32)
    eps_full = eps_full.at[:, 1:zdim // 2].set(
        jax.random.normal(k4, (B, zdim // 2 - 1), jnp.float32))

    randcol = jax.random.normal(k5, (B, 1), jnp.float32)   # replaces encoded_x[:, 0]

    perm1 = jax.random.permutation(k6, B).astype(jnp.int32)
    perm2 = jax.random.permutation(k7, B).astype(jnp.int32)

    pre_softmax, cost_dict = ffvae_forward(
        inputs, attrs, onehot, eps_full, randcol, perm1, perm2,
        enc_p, dec_p, disc_p, clf_p,
        zdim=zdim, gamma=gamma, alpha=alpha, num_classes=num_classes)

    jax.block_until_ready((pre_softmax, cost_dict["ffvae_cost"],
                           cost_dict["disc_cost"], cost_dict["main_cost"]))

    # correctness check against a pure-JAX reference of the same forward pass
    ref_pre, ref_ffvae, ref_disc, ref_main = ffvae_reference(
        inputs, attrs, onehot, eps_full, randcol, perm1, perm2,
        enc_p, dec_p, disc_p, clf_p, zdim=zdim, gamma=gamma, alpha=alpha)

    import numpy as np
    np.testing.assert_allclose(np.asarray(pre_softmax), np.asarray(ref_pre),
                               rtol=2e-3, atol=2e-3)
    np.testing.assert_allclose(float(cost_dict["ffvae_cost"]), float(ref_ffvae),
                               rtol=2e-3, atol=2e-3)
    np.testing.assert_allclose(float(cost_dict["disc_cost"]), float(ref_disc),
                               rtol=2e-3, atol=2e-3)
    np.testing.assert_allclose(float(cost_dict["main_cost"]), float(ref_main),
                               rtol=2e-3, atol=2e-3)

    print("KERNEL_OK")
</pallas_src>

<mosaic_0001>
module attributes {stable_mosaic.version = 11 : i64} {
  func.func @kernel(%arg0: memref<8xi32, #tpu.memory_space<smem>>, %arg1: memref<8xi32, #tpu.memory_space<smem>>, %arg2: memref<8x128xf32, #tpu.memory_space<vmem>>, %arg3: memref<8x12xf32, #tpu.memory_space<vmem>>, %arg4: memref<3x128x128xf32, #tpu.memory_space<vmem>>, %arg5: memref<3x1x128xf32, #tpu.memory_space<vmem>>, %arg6: memref<3x128x128xf32, #tpu.memory_space<vmem>>, %arg7: memref<3x1x128xf32, #tpu.memory_space<vmem>>, %arg8: memref<3x128x128xf32, #tpu.memory_space<vmem>>, %arg9: memref<3x1x128xf32, #tpu.memory_space<vmem>>, %arg10: memref<3x128x128xf32, #tpu.memory_space<vmem>>, %arg11: memref<3x1x128xf32, #tpu.memory_space<vmem>>, %arg12: memref<8x128xf32, #tpu.memory_space<vmem>>, %arg13: memref<1x3xf32, #tpu.memory_space<vmem>>, %arg14: memref<8x128xf32, #tpu.memory_space<vmem>>, %arg15: memref<8x128xf32, #tpu.memory_space<vmem>>, %arg16: memref<8x128xf32, #tpu.memory_space<vmem>>) attributes {dimension_semantics = [], scalar_prefetch = 0 : i64, scratch_operands = 3 : i64, tpu.core_type = #tpu.core_type<tc>} {
    %c0 = arith.constant 0 : index
    %c0_0 = arith.constant 0 : index
    %0 = vector.load %arg2[%c0, %c0_0] : memref<8x128xf32, #tpu.memory_space<vmem>>, vector<8x128xf32>
    %cst = arith.constant 1.000000e+00 : f32
    %1 = vector.broadcast %cst : f32 to vector<8x128xf32>
    %2 = arith.addf %0, %1 : vector<8x128xf32>
    %cst_1 = arith.constant 5.000000e-01 : f32
    %3 = vector.broadcast %cst_1 : f32 to vector<8x128xf32>
    %4 = arith.mulf %2, %3 : vector<8x128xf32>
    %c0_2 = arith.constant 0 : index
    %c0_3 = arith.constant 0 : index
    %5 = vector.load %arg3[%c0_2, %c0_3] : memref<8x12xf32, #tpu.memory_space<vmem>>, vector<8x12xf32>
    %6 = vector.extract_strided_slice %5 {offsets = [0, 0], sizes = [8, 1], strides = [1, 1]} : vector<8x12xf32> to vector<8x1xf32>
    %7 = vector.extract_strided_slice %5 {offsets = [0, 1], sizes = [8, 1], strides = [1, 1]} : vector<8x12xf32> to vector<8x1xf32>
    %8 = vector.extract_strided_slice %5 {offsets = [0, 2], sizes = [8, 2], strides = [1, 1]} : vector<8x12xf32> to vector<8x2xf32>
    %9 = vector.extract_strided_slice %5 {offsets = [0, 4], sizes = [8, 8], strides = [1, 1]} : vector<8x12xf32> to vector<8x8xf32>
    %c0_4 = arith.constant 0 : index
    %c0_5 = arith.constant 0 : index
    %c0_6 = arith.constant 0 : index
    %10 = vector.load %arg4[%c0_4, %c0_5, %c0_6] : memref<3x128x128xf32, #tpu.memory_space<vmem>>, vector<1x128x128xf32>
    %11 = vector.shape_cast %10 : vector<1x128x128xf32> to vector<128x128xf32>
    %cst_7 = arith.constant dense<0.000000e+00> : vector<8x128xf32>
    %12 = tpu.matmul %4, %11, %cst_7 {dimension_numbers = #tpu.dot_dimension_numbers<[1], [0], [0], [1], [0, 0, 1, 1], [], []>} : vector<8x128xf32>, vector<128x128xf32>, vector<8x128xf32> -> vector<8x128xf32>
    %c0_8 = arith.constant 0 : index
    %c0_9 = arith.constant 0 : index
    %c0_10 = arith.constant 0 : index
    %13 = vector.load %arg5[%c0_8, %c0_9, %c0_10] : memref<3x1x128xf32, #tpu.memory_space<vmem>>, vector<1x1x128xf32>
    %14 = vector.shape_cast %13 : vector<1x1x128xf32> to vector<1x128xf32>
    %15 = vector.broadcast %14 : vector<1x128xf32> to vector<8x128xf32>
    %16 = arith.addf %12, %15 : vector<8x128xf32>
    %cst_11 = arith.constant 0.000000e+00 : f32
    %17 = vector.broadcast %cst_11 : f32 to vector<8x128xf32>
    %18 = arith.cmpf oge, %16, %17 : vector<8x128xf32>
    %cst_12 = arith.constant 0.00999999977 : f32
    %19 = vector.broadcast %cst_12 : f32 to vector<8x128xf32>
    %20 = arith.mulf %19, %16 : vector<8x128xf32>
    %21 = arith.select %18, %16, %20 : vector<8x128xi1>, vector<8x128xf32>
    %c1 = arith.constant 1 : index
    %c0_13 = arith.constant 0 : index
    %c0_14 = arith.constant 0 : index
    %22 = vector.load %arg4[%c1, %c0_13, %c0_14] : memref<3x128x128xf32, #tpu.memory_space<vmem>>, vector<1x128x128xf32>
    %23 = vector.shape_cast %22 : vector<1x128x128xf32> to vector<128x128xf32>
    %cst_15 = arith.constant dense<0.000000e+00> : vector<8x128xf32>
    %24 = tpu.matmul %21, %23, %cst_15 {dimension_numbers = #tpu.dot_dimension_numbers<[1], [0], [0], [1], [0, 0, 1, 1], [], []>} : vector<8x128xf32>, vector<128x128xf32>, vector<8x128xf32> -> vector<8x128xf32>
    %c1_16 = arith.constant 1 : index
    %c0_17 = arith.constant 0 : index
    %c0_18 = arith.constant 0 : index
    %25 = vector.load %arg5[%c1_16, %c0_17, %c0_18] : memref<3x1x128xf32, #tpu.memory_space<vmem>>, vector<1x1x128xf32>
    %26 = vector.shape_cast %25 : vector<1x1x128xf32> to vector<1x128xf32>
    %27 = vector.broadcast %26 : vector<1x128xf32> to vector<8x128xf32>
    %28 = arith.addf %24, %27 : vector<8x128xf32>
    %cst_19 = arith.constant 0.000000e+00 : f32
    %29 = vector.broadcast %cst_19 : f32 to vector<8x128xf32>
    %30 = arith.cmpf oge, %28, %29 : vector<8x128xf32>
    %cst_20 = arith.constant 0.00999999977 : f32
    %31 = vector.broadcast %cst_20 : f32 to vector<8x128xf32>
    %32 = arith.mulf %31, %28 : vector<8x128xf32>
    %33 = arith.select %30, %28, %32 : vector<8x128xi1>, vector<8x128xf32>
    %c2 = arith.constant 2 : index
    %c0_21 = arith.constant 0 : index
    %c0_22 = arith.constant 0 : index
    %34 = vector.load %arg4[%c2, %c0_21, %c0_22] : memref<3x128x128xf32, #tpu.memory_space<vmem>>, vector<1x128x128xf32>
    %35 = vector.shape_cast %34 : vector<1x128x128xf32> to vector<128x128xf32>
    %cst_23 = arith.constant dense<0.000000e+00> : vector<8x128xf32>
    %36 = tpu.matmul %33, %35, %cst_23 {dimension_numbers = #tpu.dot_dimension_numbers<[1], [0], [0], [1], [0, 0, 1, 1], [], []>} : vector<8x128xf32>, vector<128x128xf32>, vector<8x128xf32> -> vector<8x128xf32>
    %c2_24 = arith.constant 2 : index
    %c0_25 = arith.constant 0 : index
    %c0_26 = arith.constant 0 : index
    %37 = vector.load %arg5[%c2_24, %c0_25, %c0_26] : memref<3x1x128xf32, #tpu.memory_space<vmem>>, vector<1x1x128xf32>
    %38 = vector.shape_cast %37 : vector<1x1x128xf32> to vector<1x128xf32>
    %39 = vector.broadcast %38 : vector<1x128xf32> to vector<8x128xf32>
    %40 = arith.addf %36, %39 : vector<8x128xf32>
    %cst_27 = arith.constant 0.000000e+00 : f32
    %41 = vector.broadcast %cst_27 : f32 to vector<8x128xf32>
    %42 = arith.cmpf oge, %40, %41 : vector<8x128xf32>
    %cst_28 = arith.constant 0.00999999977 : f32
    %43 = vector.broadcast %cst_28 : f32 to vector<8x128xf32>
    %44 = arith.mulf %43, %40 : vector<8x128xf32>
    %45 = arith.select %42, %40, %44 : vector<8x128xi1>, vector<8x128xf32>
    %46 = vector.extract_strided_slice %45 {offsets = [0, 0], sizes = [8, 8], strides = [1, 1]} : vector<8x128xf32> to vector<8x8xf32>
    %47 = vector.extract_strided_slice %45 {offsets = [0, 8], sizes = [8, 8], strides = [1, 1]} : vector<8x128xf32> to vector<8x8xf32>
    %48 = tpu.iota {dimensions = array<i32: 1>} : vector<1x8xi32>
    %c0_i32 = arith.constant 0 : i32
    %49 = vector.broadcast %c0_i32 : i32 to vector<1x8xi32>
    %50 = arith.cmpi eq, %48, %49 : vector<1x8xi32>
    %c1_i32 = arith.constant 1 : i32
    %51 = vector.broadcast %c1_i32 : i32 to vector<1x8xi32>
    %52 = arith.cmpi sge, %48, %51 : vector<1x8xi32>
    %c4_i32 = arith.constant 4 : i32
    %53 = vector.broadcast %c4_i32 : i32 to vector<1x8xi32>
    %54 = arith.cmpi slt, %48, %53 : vector<1x8xi32>
    %55 = arith.andi %52, %54 : vector<1x8xi1>
    %cst_29 = arith.constant 5.000000e-01 : f32
    %56 = vector.broadcast %cst_29 : f32 to vector<8x8xf32>
    %57 = arith.mulf %56, %47 : vector<8x8xf32>
    %58 = math.exp %57 : vector<8x8xf32>
    %59 = arith.mulf %58, %9 : vector<8x8xf32>
    %60 = arith.addf %46, %59 : vector<8x8xf32>
    %cst_30 = arith.constant 0.000000e+00 : f32
    %61 = vector.broadcast %cst_30 : f32 to vector<8x8xf32>
    %62 = vector.shape_cast %55 : vector<1x8xi1> to vector<1x8xi1>
    %63 = vector.broadcast %62 : vector<1x8xi1> to vector<8x8xi1>
    %64 = arith.select %63, %60, %61 : vector<8x8xi1>, vector<8x8xf32>
    %65 = vector.shape_cast %50 : vector<1x8xi1> to vector<1x8xi1>
    %66 = vector.broadcast %65 : vector<1x8xi1> to vector<8x8xi1>
    %67 = arith.select %66, %46, %64 : vector<8x8xi1>, vector<8x8xf32>
    %cst_31 = arith.constant 0.000000e+00 : f32
    %68 = vector.broadcast %cst_31 : f32 to vector<8x120xf32>
    %69 = tpu.concatenate %67, %68 in 1 : vector<8x8xf32>, vector<8x120xf32> -> vector<8x128xf32>
    %c0_32 = arith.constant 0 : index
    %c0_33 = arith.constant 0 : index
    %70 = vector.load %arg14[%c0_32, %c0_33] : memref<8x128xf32, #tpu.memory_space<vmem>>, vector<8x128xf32>
    tpu.vector_store %arg14[%c0_32, %c0_33], %69 {strides = array<i32>} : memref<8x128xf32, #tpu.memory_space<vmem>>, vector<8x128xf32>,
    %c0_i32_34 = arith.constant 0 : i32
    %c8_i32 = arith.constant 8 : i32
    %71 = arith.addi %c0_i32_34, %c8_i32 : i32
    %c1_i32_35 = arith.constant 1 : i32
    scf.for %arg17 = %c0_i32_34 to %71 step %c1_i32_35  : i32 {
      %318 = arith.index_cast %arg17 : i32 to index
      %319 = memref.load %arg0[%318] : memref<8xi32, #tpu.memory_space<smem>>
      %320 = arith.index_cast %arg17 : i32 to index
      %321 = memref.load %arg1[%320] : memref<8xi32, #tpu.memory_space<smem>>
      %322 = arith.index_cast %319 : i32 to index
      %c0_166 = arith.constant 0 : index
      %323 = vector.load %arg14[%322, %c0_166] : memref<8x128xf32, #tpu.memory_space<vmem>>, vector<1x128xf32>
      %324 = arith.index_cast %arg17 : i32 to index
      %c0_167 = arith.constant 0 : index
      %325 = vector.load %arg15[%324, %c0_167] : memref<8x128xf32, #tpu.memory_space<vmem>>, vector<1x128xf32>
      tpu.vector_store %arg15[%324, %c0_167], %323 {strides = array<i32>} : memref<8x128xf32, #tpu.memory_space<vmem>>, vector<1x128xf32>,
      %326 = arith.index_cast %321 : i32 to index
      %c0_168 = arith.constant 0 : index
      %327 = vector.load %arg14[%326, %c0_168] : memref<8x128xf32, #tpu.memory_space<vmem>>, vector<1x128xf32>
      %328 = arith.index_cast %arg17 : i32 to index
      %c0_169 = arith.constant 0 : index
      %329 = vector.load %arg16[%328, %c0_169] : memref<8x128xf32, #tpu.memory_space<vmem>>, vector<1x128xf32>
      tpu.vector_store %arg16[%328, %c0_169], %327 {strides = array<i32>} : memref<8x128xf32, #tpu.memory_space<vmem>>, vector<1x128xf32>,
    }
    %c8_i32_36 = arith.constant 8 : i32
    %72 = tpu.iota {dimensions = array<i32: 1>} : vector<1x128xi32>
    %c0_i32_37 = arith.constant 0 : i32
    %73 = vector.broadcast %c0_i32_37 : i32 to vector<1x128xi32>
    %74 = arith.cmpi eq, %72, %73 : vector<1x128xi32>
    %c0_38 = arith.constant 0 : index
    %c0_39 = arith.constant 0 : index
    %75 = vector.load %arg15[%c0_38, %c0_39] : memref<8x128xf32, #tpu.memory_space<vmem>>, vector<8x128xf32>
    %c0_40 = arith.constant 0 : index
    %c0_41 = arith.constant 0 : index
    %76 = vector.load %arg16[%c0_40, %c0_41] : memref<8x128xf32, #tpu.memory_space<vmem>>, vector<8x128xf32>
    %77 = vector.shape_cast %74 : vector<1x128xi1> to vector<1x128xi1>
    %78 = vector.broadcast %77 : vector<1x128xi1> to vector<8x128xi1>
    %79 = arith.select %78, %75, %76 : vector<8x128xi1>, vector<8x128xf32>
    %c0_42 = arith.constant 0 : index
    %c0_43 = arith.constant 0 : index
    %c0_44 = arith.constant 0 : index
    %80 = vector.load %arg6[%c0_42, %c0_43, %c0_44] : memref<3x128x128xf32, #tpu.memory_space<vmem>>, vector<1x128x128xf32>
    %81 = vector.shape_cast %80 : vector<1x128x128xf32> to vector<128x128xf32>
    %cst_45 = arith.constant dense<0.000000e+00> : vector<8x128xf32>
    %82 = tpu.matmul %69, %81, %cst_45 {dimension_numbers = #tpu.dot_dimension_numbers<[1], [0], [0], [1], [0, 0, 1, 1], [], []>} : vector<8x128xf32>, vector<128x128xf32>, vector<8x128xf32> -> vector<8x128xf32>
    %c0_46 = arith.constant 0 : index
    %c0_47 = arith.constant 0 : index
    %c0_48 = arith.constant 0 : index
    %83 = vector.load %arg7[%c0_46, %c0_47, %c0_48] : memref<3x1x128xf32, #tpu.memory_space<vmem>>, vector<1x1x128xf32>
    %84 = vector.shape_cast %83 : vector<1x1x128xf32> to vector<1x128xf32>
    %85 = vector.broadcast %84 : vector<1x128xf32> to vector<8x128xf32>
    %86 = arith.addf %82, %85 : vector<8x128xf32>
    %cst_49 = arith.constant 0.000000e+00 : f32
    %87 = vector.broadcast %cst_49 : f32 to vector<8x128xf32>
    %88 = arith.cmpf oge, %86, %87 : vector<8x128xf32>
    %cst_50 = arith.constant 0.00999999977 : f32
    %89 = vector.broadcast %cst_50 : f32 to vector<8x128xf32>
    %90 = arith.mulf %89, %86 : vector<8x128xf32>
    %91 = arith.select %88, %86, %90 : vector<8x128xi1>, vector<8x128xf32>
    %c1_51 = arith.constant 1 : index
    %c0_52 = arith.constant 0 : index
    %c0_53 = arith.constant 0 : index
    %92 = vector.load %arg6[%c1_51, %c0_52, %c0_53] : memref<3x128x128xf32, #tpu.memory_space<vmem>>, vector<1x128x128xf32>
    %93 = vector.shape_cast %92 : vector<1x128x128xf32> to vector<128x128xf32>
    %cst_54 = arith.constant dense<0.000000e+00> : vector<8x128xf32>
    %94 = tpu.matmul %91, %93, %cst_54 {dimension_numbers = #tpu.dot_dimension_numbers<[1], [0], [0], [1], [0, 0, 1, 1], [], []>} : vector<8x128xf32>, vector<128x128xf32>, vector<8x128xf32> -> vector<8x128xf32>
    %c1_55 = arith.constant 1 : index
    %c0_56 = arith.constant 0 : index
    %c0_57 = arith.constant 0 : index
    %95 = vector.load %arg7[%c1_55, %c0_56, %c0_57] : memref<3x1x128xf32, #tpu.memory_space<vmem>>, vector<1x1x128xf32>
    %96 = vector.shape_cast %95 : vector<1x1x128xf32> to vector<1x128xf32>
    %97 = vector.broadcast %96 : vector<1x128xf32> to vector<8x128xf32>
    %98 = arith.addf %94, %97 : vector<8x128xf32>
    %cst_58 = arith.constant 0.000000e+00 : f32
    %99 = vector.broadcast %cst_58 : f32 to vector<8x128xf32>
    %100 = arith.cmpf oge, %98, %99 : vector<8x128xf32>
    %cst_59 = arith.constant 0.00999999977 : f32
    %101 = vector.broadcast %cst_59 : f32 to vector<8x128xf32>
    %102 = arith.mulf %101, %98 : vector<8x128xf32>
    %103 = arith.select %100, %98, %102 : vector<8x128xi1>, vector<8x128xf32>
    %c2_60 = arith.constant 2 : index
    %c0_61 = arith.constant 0 : index
    %c0_62 = arith.constant 0 : index
    %104 = vector.load %arg6[%c2_60, %c0_61, %c0_62] : memref<3x128x128xf32, #tpu.memory_space<vmem>>, vector<1x128x128xf32>
    %105 = vector.shape_cast %104 : vector<1x128x128xf32> to vector<128x128xf32>
    %cst_63 = arith.constant dense<0.000000e+00> : vector<8x128xf32>
    %106 = tpu.matmul %103, %105, %cst_63 {dimension_numbers = #tpu.dot_dimension_numbers<[1], [0], [0], [1], [0, 0, 1, 1], [], []>} : vector<8x128xf32>, vector<128x128xf32>, vector<8x128xf32> -> vector<8x128xf32>
    %c2_64 = arith.constant 2 : index
    %c0_65 = arith.constant 0 : index
    %c0_66 = arith.constant 0 : index
    %107 = vector.load %arg7[%c2_64, %c0_65, %c0_66] : memref<3x1x128xf32, #tpu.memory_space<vmem>>, vector<1x1x128xf32>
    %108 = vector.shape_cast %107 : vector<1x1x128xf32> to vector<1x128xf32>
    %109 = vector.broadcast %108 : vector<1x128xf32> to vector<8x128xf32>
    %110 = arith.addf %106, %109 : vector<8x128xf32>
    %cst_67 = arith.constant 0.000000e+00 : f32
    %111 = vector.broadcast %cst_67 : f32 to vector<8x128xf32>
    %112 = arith.cmpf oge, %110, %111 : vector<8x128xf32>
    %cst_68 = arith.constant 0.00999999977 : f32
    %113 = vector.broadcast %cst_68 : f32 to vector<8x128xf32>
    %114 = arith.mulf %113, %110 : vector<8x128xf32>
    %115 = arith.select %112, %110, %114 : vector<8x128xi1>, vector<8x128xf32>
    %116 = vector.extract_strided_slice %4 {offsets = [0, 0], sizes = [8, 16], strides = [1, 1]} : vector<8x128xf32> to vector<8x16xf32>
    %117 = vector.extract_strided_slice %115 {offsets = [0, 0], sizes = [8, 16], strides = [1, 1]} : vector<8x128xf32> to vector<8x16xf32>
    %118 = arith.subf %116, %117 : vector<8x16xf32>
    %cst_69 = arith.constant -5.000000e-01 : f32
    %119 = vector.broadcast %cst_69 : f32 to vector<8x16xf32>
    %120 = arith.mulf %119, %118 : vector<8x16xf32>
    %121 = arith.mulf %120, %118 : vector<8x16xf32>
    %cst_70 = arith.constant 0.918938517 : f32
    %122 = vector.broadcast %cst_70 : f32 to vector<8x16xf32>
    %123 = arith.subf %121, %122 : vector<8x16xf32>
    %cst_71 = arith.constant dense<0.000000e+00> : vector<8xf32>
    %124 = vector.multi_reduction <add>, %123, %cst_71 [1] : vector<8x16xf32> to vector<8xf32>
    %125 = vector.shape_cast %124 : vector<8xf32> to vector<8x1xf32>
    %cst_72 = arith.constant -5.000000e-01 : f32
    %126 = vector.broadcast %cst_72 : f32 to vector<8x8xf32>
    %127 = arith.mulf %126, %47 : vector<8x8xf32>
    %128 = arith.mulf %58, %58 : vector<8x8xf32>
    %129 = arith.mulf %46, %46 : vector<8x8xf32>
    %130 = arith.addf %128, %129 : vector<8x8xf32>
    %cst_73 = arith.constant 5.000000e-01 : f32
    %131 = vector.broadcast %cst_73 : f32 to vector<8x8xf32>
    %132 = arith.mulf %131, %130 : vector<8x8xf32>
    %133 = arith.addf %127, %132 : vector<8x8xf32>
    %cst_74 = arith.constant 5.000000e-01 : f32
    %134 = vector.broadcast %cst_74 : f32 to vector<8x8xf32>
    %135 = arith.subf %133, %134 : vector<8x8xf32>
    %136 = vector.shape_cast %55 : vector<1x8xi1> to vector<1x8xi1>
    %137 = vector.broadcast %136 : vector<1x8xi1> to vector<8x8xi1>
    %138 = arith.select %137, %135, %61 : vector<8x8xi1>, vector<8x8xf32>
    %cst_75 = arith.constant dense<0.000000e+00> : vector<8xf32>
    %139 = vector.multi_reduction <add>, %138, %cst_75 [1] : vector<8x8xf32> to vector<8xf32>
    %140 = vector.shape_cast %139 : vector<8xf32> to vector<8x1xf32>
    %141 = arith.subf %125, %140 : vector<8x1xf32>
    %cst_76 = arith.constant dense<0.000000e+00> : vector<1xf32>
    %142 = vector.multi_reduction <add>, %141, %cst_76 [0] : vector<8x1xf32> to vector<1xf32>
    %143 = vector.shape_cast %142 : vector<1xf32> to vector<1x1xf32>
    %cst_77 = arith.constant 8.000000e+00 : f32
    %144 = vector.broadcast %cst_77 : f32 to vector<1x1xf32>
    %145 = arith.divf %143, %144 : vector<1x1xf32>
    %146 = vector.extract_strided_slice %46 {offsets = [0, 0], sizes = [8, 1], strides = [1, 1]} : vector<8x8xf32> to vector<8x1xf32>
    %cst_78 = arith.constant 0.000000e+00 : f32
    %147 = vector.broadcast %cst_78 : f32 to vector<8x1xf32>
    %148 = arith.maximumf %146, %147 : vector<8x1xf32>
    %149 = arith.mulf %146, %6 : vector<8x1xf32>
    %150 = arith.subf %148, %149 : vector<8x1xf32>
    %151 = math.absf %146 : vector<8x1xf32>
    %cst_79 = arith.constant 0.000000e+00 : f32
    %152 = vector.broadcast %cst_79 : f32 to vector<8x1xf32>
    %153 = arith.subf %152, %151 : vector<8x1xf32>
    %154 = math.exp %153 : vector<8x1xf32>
    %cst_80 = arith.constant 1.000000e+00 : f32
    %155 = vector.broadcast %cst_80 : f32 to vector<8x1xf32>
    %156 = arith.addf %155, %154 : vector<8x1xf32>
    %157 = math.log %156 : vector<8x1xf32>
    %158 = arith.addf %150, %157 : vector<8x1xf32>
    %cst_81 = arith.constant dense<0.000000e+00> : vector<1xf32>
    %159 = vector.multi_reduction <add>, %158, %cst_81 [0] : vector<8x1xf32> to vector<1xf32>
    %160 = vector.shape_cast %159 : vector<1xf32> to vector<1x1xf32>
    %cst_82 = arith.constant 8.000000e+00 : f32
    %161 = vector.broadcast %cst_82 : f32 to vector<1x1xf32>
    %162 = arith.divf %160, %161 : vector<1x1xf32>
    %163 = tpu.concatenate %69, %79 in 0 : vector<8x128xf32>, vector<8x128xf32> -> vector<16x128xf32>
    %c0_83 = arith.constant 0 : index
    %c0_84 = arith.constant 0 : index
    %c0_85 = arith.constant 0 : index
    %164 = vector.load %arg8[%c0_83, %c0_84, %c0_85] : memref<3x128x128xf32, #tpu.memory_space<vmem>>, vector<1x128x128xf32>
    %165 = vector.shape_cast %164 : vector<1x128x128xf32> to vector<128x128xf32>
    %cst_86 = arith.constant dense<0.000000e+00> : vector<16x128xf32>
    %166 = tpu.matmul %163, %165, %cst_86 {dimension_numbers = #tpu.dot_dimension_numbers<[1], [0], [0], [1], [0, 0, 1, 1], [], []>} : vector<16x128xf32>, vector<128x128xf32>, vector<16x128xf32> -> vector<16x128xf32>
    %c0_87 = arith.constant 0 : index
    %c0_88 = arith.constant 0 : index
    %c0_89 = arith.constant 0 : index
    %167 = vector.load %arg9[%c0_87, %c0_88, %c0_89] : memref<3x1x128xf32, #tpu.memory_space<vmem>>, vector<1x1x128xf32>
    %168 = vector.shape_cast %167 : vector<1x1x128xf32> to vector<1x128xf32>
    %169 = vector.broadcast %168 : vector<1x128xf32> to vector<16x128xf32>
    %170 = arith.addf %166, %169 : vector<16x128xf32>
    %cst_90 = arith.constant 0.000000e+00 : f32
    %171 = vector.broadcast %cst_90 : f32 to vector<16x128xf32>
    %172 = arith.cmpf oge, %170, %171 : vector<16x128xf32>
    %cst_91 = arith.constant 0.00999999977 : f32
    %173 = vector.broadcast %cst_91 : f32 to vector<16x128xf32>
    %174 = arith.mulf %173, %170 : vector<16x128xf32>
    %175 = arith.select %172, %170, %174 : vector<16x128xi1>, vector<16x128xf32>
    %c1_92 = arith.constant 1 : index
    %c0_93 = arith.constant 0 : index
    %c0_94 = arith.constant 0 : index
    %176 = vector.load %arg8[%c1_92, %c0_93, %c0_94] : memref<3x128x128xf32, #tpu.memory_space<vmem>>, vector<1x128x128xf32>
    %177 = vector.shape_cast %176 : vector<1x128x128xf32> to vector<128x128xf32>
    %cst_95 = arith.constant dense<0.000000e+00> : vector<16x128xf32>
    %178 = tpu.matmul %175, %177, %cst_95 {dimension_numbers = #tpu.dot_dimension_numbers<[1], [0], [0], [1], [0, 0, 1, 1], [], []>} : vector<16x128xf32>, vector<128x128xf32>, vector<16x128xf32> -> vector<16x128xf32>
    %c1_96 = arith.constant 1 : index
    %c0_97 = arith.constant 0 : index
    %c0_98 = arith.constant 0 : index
    %179 = vector.load %arg9[%c1_96, %c0_97, %c0_98] : memref<3x1x128xf32, #tpu.memory_space<vmem>>, vector<1x1x128xf32>
    %180 = vector.shape_cast %179 : vector<1x1x128xf32> to vector<1x128xf32>
    %181 = vector.broadcast %180 : vector<1x128xf32> to vector<16x128xf32>
    %182 = arith.addf %178, %181 : vector<16x128xf32>
    %cst_99 = arith.constant 0.000000e+00 : f32
    %183 = vector.broadcast %cst_99 : f32 to vector<16x128xf32>
    %184 = arith.cmpf oge, %182, %183 : vector<16x128xf32>
    %cst_100 = arith.constant 0.00999999977 : f32
    %185 = vector.broadcast %cst_100 : f32 to vector<16x128xf32>
    %186 = arith.mulf %185, %182 : vector<16x128xf32>
    %187 = arith.select %184, %182, %186 : vector<16x128xi1>, vector<16x128xf32>
    %c2_101 = arith.constant 2 : index
    %c0_102 = arith.constant 0 : index
    %c0_103 = arith.constant 0 : index
    %188 = vector.load %arg8[%c2_101, %c0_102, %c0_103] : memref<3x128x128xf32, #tpu.memory_space<vmem>>, vector<1x128x128xf32>
    %189 = vector.shape_cast %188 : vector<1x128x128xf32> to vector<128x128xf32>
    %cst_104 = arith.constant dense<0.000000e+00> : vector<16x128xf32>
    %190 = tpu.matmul %187, %189, %cst_104 {dimension_numbers = #tpu.dot_dimension_numbers<[1], [0], [0], [1], [0, 0, 1, 1], [], []>} : vector<16x128xf32>, vector<128x128xf32>, vector<16x128xf32> -> vector<16x128xf32>
    %c2_105 = arith.constant 2 : index
    %c0_106 = arith.constant 0 : index
    %c0_107 = arith.constant 0 : index
    %191 = vector.load %arg9[%c2_105, %c0_106, %c0_107] : memref<3x1x128xf32, #tpu.memory_space<vmem>>, vector<1x1x128xf32>
    %192 = vector.shape_cast %191 : vector<1x1x128xf32> to vector<1x128xf32>
    %193 = vector.broadcast %192 : vector<1x128xf32> to vector<16x128xf32>
    %194 = arith.addf %190, %193 : vector<16x128xf32>
    %cst_108 = arith.constant 0.000000e+00 : f32
    %195 = vector.broadcast %cst_108 : f32 to vector<16x128xf32>
    %196 = arith.cmpf oge, %194, %195 : vector<16x128xf32>
    %cst_109 = arith.constant 0.00999999977 : f32
    %197 = vector.broadcast %cst_109 : f32 to vector<16x128xf32>
    %198 = arith.mulf %197, %194 : vector<16x128xf32>
    %199 = arith.select %196, %194, %198 : vector<16x128xi1>, vector<16x128xf32>
    %200 = vector.extract_strided_slice %199 {offsets = [0, 0], sizes = [8, 2], strides = [1, 1]} : vector<16x128xf32> to vector<8x2xf32>
    %201 = vector.extract_strided_slice %199 {offsets = [8, 0], sizes = [8, 2], strides = [1, 1]} : vector<16x128xf32> to vector<8x2xf32>
    %202 = vector.extract_strided_slice %200 {offsets = [0, 0], sizes = [8, 1], strides = [1, 1]} : vector<8x2xf32> to vector<8x1xf32>
    %203 = vector.extract_strided_slice %200 {offsets = [0, 1], sizes = [8, 1], strides = [1, 1]} : vector<8x2xf32> to vector<8x1xf32>
    %204 = arith.subf %202, %203 : vector<8x1xf32>
    %cst_110 = arith.constant dense<0.000000e+00> : vector<1xf32>
    %205 = vector.multi_reduction <add>, %204, %cst_110 [0] : vector<8x1xf32> to vector<1xf32>
    %206 = vector.shape_cast %205 : vector<1xf32> to vector<1x1xf32>
    %cst_111 = arith.constant 8.000000e+00 : f32
    %207 = vector.broadcast %cst_111 : f32 to vector<1x1xf32>
    %208 = arith.divf %206, %207 : vector<1x1xf32>
    %cst_112 = arith.constant -1.000000e+00 : f32
    %209 = vector.broadcast %cst_112 : f32 to vector<1x1xf32>
    %210 = arith.mulf %209, %145 : vector<1x1xf32>
    %cst_113 = arith.constant 1.000000e+01 : f32
    %211 = vector.broadcast %cst_113 : f32 to vector<1x1xf32>
    %212 = arith.mulf %211, %208 : vector<1x1xf32>
    %213 = arith.addf %210, %212 : vector<1x1xf32>
    %cst_114 = arith.constant 1.000000e+00 : f32
    %214 = vector.broadcast %cst_114 : f32 to vector<1x1xf32>
    %215 = arith.mulf %214, %162 : vector<1x1xf32>
    %216 = arith.addf %213, %215 : vector<1x1xf32>
    %cst_115 = arith.constant dense<0xFF800000> : vector<8xf32>
    %217 = vector.multi_reduction <maximumf>, %200, %cst_115 [1] : vector<8x2xf32> to vector<8xf32>
    %218 = vector.shape_cast %217 : vector<8xf32> to vector<8x1xf32>
    %219 = vector.broadcast %218 : vector<8x1xf32> to vector<8x2xf32>
    %220 = arith.subf %200, %219 : vector<8x2xf32>
    %221 = math.exp %220 : vector<8x2xf32>
    %cst_116 = arith.constant dense<0.000000e+00> : vector<8xf32>
    %222 = vector.multi_reduction <add>, %221, %cst_116 [1] : vector<8x2xf32> to vector<8xf32>
    %223 = vector.shape_cast %222 : vector<8xf32> to vector<8x1xf32>
    %224 = math.log %223 : vector<8x1xf32>
    %225 = arith.addf %218, %224 : vector<8x1xf32>
    %226 = vector.extract_strided_slice %200 {offsets = [0, 0], sizes = [8, 1], strides = [1, 1]} : vector<8x2xf32> to vector<8x1xf32>
    %227 = arith.subf %225, %226 : vector<8x1xf32>
    %cst_117 = arith.constant dense<0.000000e+00> : vector<1xf32>
    %228 = vector.multi_reduction <add>, %227, %cst_117 [0] : vector<8x1xf32> to vector<1xf32>
    %229 = vector.shape_cast %228 : vector<1xf32> to vector<1x1xf32>
    %cst_118 = arith.constant 8.000000e+00 : f32
    %230 = vector.broadcast %cst_118 : f32 to vector<1x1xf32>
    %231 = arith.divf %229, %230 : vector<1x1xf32>
    %cst_119 = arith.constant dense<0xFF800000> : vector<8xf32>
    %232 = vector.multi_reduction <maximumf>, %201, %cst_119 [1] : vector<8x2xf32> to vector<8xf32>
    %233 = vector.shape_cast %232 : vector<8xf32> to vector<8x1xf32>
    %234 = vector.broadcast %233 : vector<8x1xf32> to vector<8x2xf32>
    %235 = arith.subf %201, %234 : vector<8x2xf32>
    %236 = math.exp %235 : vector<8x2xf32>
    %cst_120 = arith.constant dense<0.000000e+00> : vector<8xf32>
    %237 = vector.multi_reduction <add>, %236, %cst_120 [1] : vector<8x2xf32> to vector<8xf32>
    %238 = vector.shape_cast %237 : vector<8xf32> to vector<8x1xf32>
    %239 = math.log %238 : vector<8x1xf32>
    %240 = arith.addf %233, %239 : vector<8x1xf32>
    %241 = vector.extract_strided_slice %201 {offsets = [0, 1], sizes = [8, 1], strides = [1, 1]} : vector<8x2xf32> to vector<8x1xf32>
    %242 = arith.subf %240, %241 : vector<8x1xf32>
    %cst_121 = arith.constant dense<0.000000e+00> : vector<1xf32>
    %243 = vector.multi_reduction <add>, %242, %cst_121 [0] : vector<8x1xf32> to vector<1xf32>
    %244 = vector.shape_cast %243 : vector<1xf32> to vector<1x1xf32>
    %cst_122 = arith.constant 8.000000e+00 : f32
    %245 = vector.broadcast %cst_122 : f32 to vector<1x1xf32>
    %246 = arith.divf %244, %245 : vector<1x1xf32>
    %247 = arith.addf %231, %246 : vector<1x1xf32>
    %cst_123 = arith.constant 5.000000e-01 : f32
    %248 = vector.broadcast %cst_123 : f32 to vector<1x1xf32>
    %249 = arith.mulf %248, %247 : vector<1x1xf32>
    %250 = vector.shape_cast %50 : vector<1x8xi1> to vector<1x8xi1>
    %251 = vector.broadcast %250 : vector<1x8xi1> to vector<8x8xi1>
    %252 = vector.shape_cast %7 : vector<8x1xf32> to vector<8x1xf32>
    %253 = vector.broadcast %252 : vector<8x1xf32> to vector<8x8xf32>
    %254 = arith.select %251, %253, %46 : vector<8x8xi1>, vector<8x8xf32>
    %cst_124 = arith.constant 0.000000e+00 : f32
    %255 = vector.broadcast %cst_124 : f32 to vector<8x120xf32>
    %256 = tpu.concatenate %254, %255 in 1 : vector<8x8xf32>, vector<8x120xf32> -> vector<8x128xf32>
    %c0_125 = arith.constant 0 : index
    %c0_126 = arith.constant 0 : index
    %c0_127 = arith.constant 0 : index
    %257 = vector.load %arg10[%c0_125, %c0_126, %c0_127] : memref<3x128x128xf32, #tpu.memory_space<vmem>>, vector<1x128x128xf32>
    %258 = vector.shape_cast %257 : vector<1x128x128xf32> to vector<128x128xf32>
    %cst_128 = arith.constant dense<0.000000e+00> : vector<8x128xf32>
    %259 = tpu.matmul %256, %258, %cst_128 {dimension_numbers = #tpu.dot_dimension_numbers<[1], [0], [0], [1], [0, 0, 1, 1], [], []>} : vector<8x128xf32>, vector<128x128xf32>, vector<8x128xf32> -> vector<8x128xf32>
    %c0_129 = arith.constant 0 : index
    %c0_130 = arith.constant 0 : index
    %c0_131 = arith.constant 0 : index
    %260 = vector.load %arg11[%c0_129, %c0_130, %c0_131] : memref<3x1x128xf32, #tpu.memory_space<vmem>>, vector<1x1x128xf32>
    %261 = vector.shape_cast %260 : vector<1x1x128xf32> to vector<1x128xf32>
    %262 = vector.broadcast %261 : vector<1x128xf32> to vector<8x128xf32>
    %263 = arith.addf %259, %262 : vector<8x128xf32>
    %cst_132 = arith.constant 0.000000e+00 : f32
    %264 = vector.broadcast %cst_132 : f32 to vector<8x128xf32>
    %265 = arith.cmpf oge, %263, %264 : vector<8x128xf32>
    %cst_133 = arith.constant 0.00999999977 : f32
    %266 = vector.broadcast %cst_133 : f32 to vector<8x128xf32>
    %267 = arith.mulf %266, %263 : vector<8x128xf32>
    %268 = arith.select %265, %263, %267 : vector<8x128xi1>, vector<8x128xf32>
    %c1_134 = arith.constant 1 : index
    %c0_135 = arith.constant 0 : index
    %c0_136 = arith.constant 0 : index
    %269 = vector.load %arg10[%c1_134, %c0_135, %c0_136] : memref<3x128x128xf32, #tpu.memory_space<vmem>>, vector<1x128x128xf32>
    %270 = vector.shape_cast %269 : vector<1x128x128xf32> to vector<128x128xf32>
    %cst_137 = arith.constant dense<0.000000e+00> : vector<8x128xf32>
    %271 = tpu.matmul %268, %270, %cst_137 {dimension_numbers = #tpu.dot_dimension_numbers<[1], [0], [0], [1], [0, 0, 1, 1], [], []>} : vector<8x128xf32>, vector<128x128xf32>, vector<8x128xf32> -> vector<8x128xf32>
    %c1_138 = arith.constant 1 : index
    %c0_139 = arith.constant 0 : index
    %c0_140 = arith.constant 0 : index
    %272 = vector.load %arg11[%c1_138, %c0_139, %c0_140] : memref<3x1x128xf32, #tpu.memory_space<vmem>>, vector<1x1x128xf32>
    %273 = vector.shape_cast %272 : vector<1x1x128xf32> to vector<1x128xf32>
    %274 = vector.broadcast %273 : vector<1x128xf32> to vector<8x128xf32>
    %275 = arith.addf %271, %274 : vector<8x128xf32>
    %cst_141 = arith.constant 0.000000e+00 : f32
    %276 = vector.broadcast %cst_141 : f32 to vector<8x128xf32>
    %277 = arith.cmpf oge, %275, %276 : vector<8x128xf32>
    %cst_142 = arith.constant 0.00999999977 : f32
    %278 = vector.broadcast %cst_142 : f32 to vector<8x128xf32>
    %279 = arith.mulf %278, %275 : vector<8x128xf32>
    %280 = arith.select %277, %275, %279 : vector<8x128xi1>, vector<8x128xf32>
    %c2_143 = arith.constant 2 : index
    %c0_144 = arith.constant 0 : index
    %c0_145 = arith.constant 0 : index
    %281 = vector.load %arg10[%c2_143, %c0_144, %c0_145] : memref<3x128x128xf32, #tpu.memory_space<vmem>>, vector<1x128x128xf32>
    %282 = vector.shape_cast %281 : vector<1x128x128xf32> to vector<128x128xf32>
    %cst_146 = arith.constant dense<0.000000e+00> : vector<8x128xf32>
    %283 = tpu.matmul %280, %282, %cst_146 {dimension_numbers = #tpu.dot_dimension_numbers<[1], [0], [0], [1], [0, 0, 1, 1], [], []>} : vector<8x128xf32>, vector<128x128xf32>, vector<8x128xf32> -> vector<8x128xf32>
    %c2_147 = arith.constant 2 : index
    %c0_148 = arith.constant 0 : index
    %c0_149 = arith.constant 0 : index
    %284 = vector.load %arg11[%c2_147, %c0_148, %c0_149] : memref<3x1x128xf32, #tpu.memory_space<vmem>>, vector<1x1x128xf32>
    %285 = vector.shape_cast %284 : vector<1x1x128xf32> to vector<1x128xf32>
    %286 = vector.broadcast %285 : vector<1x128xf32> to vector<8x128xf32>
    %287 = arith.addf %283, %286 : vector<8x128xf32>
    %cst_150 = arith.constant 0.000000e+00 : f32
    %288 = vector.broadcast %cst_150 : f32 to vector<8x128xf32>
    %289 = arith.cmpf oge, %287, %288 : vector<8x128xf32>
    %cst_151 = arith.constant 0.00999999977 : f32
    %290 = vector.broadcast %cst_151 : f32 to vector<8x128xf32>
    %291 = arith.mulf %290, %287 : vector<8x128xf32>
    %292 = arith.select %289, %287, %291 : vector<8x128xi1>, vector<8x128xf32>
    %293 = vector.extract_strided_slice %292 {offsets = [0, 0], sizes = [8, 2], strides = [1, 1]} : vector<8x128xf32> to vector<8x2xf32>
    %cst_152 = arith.constant dense<0xFF800000> : vector<8xf32>
    %294 = vector.multi_reduction <maximumf>, %293, %cst_152 [1] : vector<8x2xf32> to vector<8xf32>
    %295 = vector.shape_cast %294 : vector<8xf32> to vector<8x1xf32>
    %296 = vector.broadcast %295 : vector<8x1xf32> to vector<8x2xf32>
    %297 = arith.subf %293, %296 : vector<8x2xf32>
    %298 = math.exp %297 : vector<8x2xf32>
    %cst_153 = arith.constant dense<0.000000e+00> : vector<8xf32>
    %299 = vector.multi_reduction <add>, %298, %cst_153 [1] : vector<8x2xf32> to vector<8xf32>
    %300 = vector.shape_cast %299 : vector<8xf32> to vector<8x1xf32>
    %301 = math.log %300 : vector<8x1xf32>
    %302 = arith.addf %295, %301 : vector<8x1xf32>
    %303 = vector.broadcast %302 : vector<8x1xf32> to vector<8x2xf32>
    %304 = arith.subf %293, %303 : vector<8x2xf32>
    %305 = arith.mulf %8, %304 : vector<8x2xf32>
    %cst_154 = arith.constant dense<0.000000e+00> : vector<8xf32>
    %306 = vector.multi_reduction <add>, %305, %cst_154 [1] : vector<8x2xf32> to vector<8xf32>
    %307 = vector.shape_cast %306 : vector<8xf32> to vector<8x1xf32>
    %cst_155 = arith.constant 0.000000e+00 : f32
    %308 = vector.broadcast %cst_155 : f32 to vector<8x1xf32>
    %309 = arith.subf %308, %307 : vector<8x1xf32>
    %cst_156 = arith.constant dense<0.000000e+00> : vector<1xf32>
    %310 = vector.multi_reduction <add>, %309, %cst_156 [0] : vector<8x1xf32> to vector<1xf32>
    %311 = vector.shape_cast %310 : vector<1xf32> to vector<1x1xf32>
    %cst_157 = arith.constant 8.000000e+00 : f32
    %312 = vector.broadcast %cst_157 : f32 to vector<1x1xf32>
    %313 = arith.divf %311, %312 : vector<1x1xf32>
    %c0_158 = arith.constant 0 : index
    %c0_159 = arith.constant 0 : index
    %314 = vector.load %arg12[%c0_158, %c0_159] : memref<8x128xf32, #tpu.memory_space<vmem>>, vector<8x128xf32>
    tpu.vector_store %arg12[%c0_158, %c0_159], %292 {strides = array<i32>} : memref<8x128xf32, #tpu.memory_space<vmem>>, vector<8x128xf32>,
    %c0_160 = arith.constant 0 : index
    %c0_161 = arith.constant 0 : index
    %315 = vector.load %arg13[%c0_160, %c0_161] : memref<1x3xf32, #tpu.memory_space<vmem>>, vector<1x1xf32>
    tpu.vector_store %arg13[%c0_160, %c0_161], %216 {strides = array<i32>} : memref<1x3xf32, #tpu.memory_space<vmem>>, vector<1x1xf32>,
    %c0_162 = arith.constant 0 : index
    %c1_163 = arith.constant 1 : index
    %316 = vector.load %arg13[%c0_162, %c1_163] : memref<1x3xf32, #tpu.memory_space<vmem>>, vector<1x1xf32>
    tpu.vector_store %arg13[%c0_162, %c1_163], %249 {strides = array<i32>} : memref<1x3xf32, #tpu.memory_space<vmem>>, vector<1x1xf32>,
    %c0_164 = arith.constant 0 : index
    %c2_165 = arith.constant 2 : index
    %317 = vector.load %arg13[%c0_164, %c2_165] : memref<1x3xf32, #tpu.memory_space<vmem>>, vector<1x1xf32>
    tpu.vector_store %arg13[%c0_164, %c2_165], %313 {strides = array<i32>} : memref<1x3xf32, #tpu.memory_space<vmem>>, vector<1x1xf32>,
    return
  }
}

</mosaic_0001>

<bundles_post_ra>
// kernel: tpu_custom_call.1
= control target key start
LH: loop header
LB: loop body
LE: loop exit
PB: predicated region body
PF: predicated region fallthrough
CT: control target
= control target key end

     0   :  { %19 = vsyncpa [#allocation8], 0  ;;  %s2920_s0 = inlined_call_operand.hbm [shape: s32[8], index: 0, kind: input, shape index: {}]   ;;  %s2921_s1 = inlined_call_operand.hbm [shape: s32[8], index: 1, kind: input, shape index: {}]   ;;  %s2922_s2 = inlined_call_operand.hbm [shape: f32[8,128], index: 2, kind: input, shape index: {}]   ;;  %s2923_s3 = inlined_call_operand.hbm [shape: f32[8,12], index: 3, kind: input, shape index: {}]   ;;  %s2924_s4 = inlined_call_operand.hbm [shape: f32[3,128,128], index: 4, kind: input, shape index: {}]   ;;  %s2925_s5 = inlined_call_operand.vmem [shape: f32[3,1,128], index: 5, kind: input, shape index: {}]   ;;  %s2926_s6 = inlined_call_operand.hbm [shape: f32[3,128,128], index: 6, kind: input, shape index: {}]   ;;  %s2927_s7 = inlined_call_operand.vmem [shape: f32[3,1,128], index: 7, kind: input, shape index: {}]   ;;  %s2928_s8 = inlined_call_operand.hbm [shape: f32[3,128,128], index: 8, kind: input, shape index: {}]   ;;  %s2929_s9 = inlined_call_operand.vmem [shape: f32[3,1,128], index: 9, kind: input, shape index: {}]   ;;  %s2930_s10 = inlined_call_operand.hbm [shape: f32[3,128,128], index: 10, kind: input, shape index: {}]   ;;  %s2931_s11 = inlined_call_operand.vmem [shape: f32[3,1,128], index: 11, kind: input, shape index: {}]   ;;  %s2932_s12 = inlined_call_operand.hbm [shape: f32[8,128], index: 12, kind: output, shape index: {0}]   ;;  %s2933_s13 = inlined_call_operand.hbm [shape: f32[1,3], index: 13, kind: output, shape index: {1}]  }
   0x1   :  { %20 = vsyncpa [#allocation10], 0 }
   0x2   :  { %21 = vsyncpa [#allocation6], 0 }
   0x3   :  { %22 = vsyncpa [#allocation13], 0 }
   0x4   :  { %23 = vsyncpa [#allocation16], 0 }
   0x5   :  { %24 = vsyncpa [#allocation19], 0 }
   0x6   :  { %25 = vsyncpa [#allocation7], 0 }
   0x7   :  { %26 = vsyncpa [#allocation22], 0  ;;  %s2503_s25 = smov [#allocation12]  }
   0x8   :  { %s59_s26 = sshll.u32 %s2503_s25, 4  ;;  %s60_s26 = int_to_ptr.vmem [resolvable:$true] %s59_s26 }
   0x9   :  { %s2311_s27 = scalar_lea.vmem %s60_s26, 128  ;;  %p2316_p1 = scmp.lt.s32.totalorder %s60_s26, %s60_s26 }
   0xa   :  { %p2312_p0 = scmp.ne.s32.totalorder %s60_s26, %s2311_s27  ;;  %p2317_p2 = scmp.lt.s32.totalorder %s2311_s27, %s2311_s27 }
   0xc   :  { %p2318_p3 = por %p2317_p2, %p2316_p1 }
   0xe   :  { %p2319_p4 = pnand %p2318_p3, %p2312_p0 }
  0x10   :  { %2322 = shalt.err (!%p2319_p4)
}
  0x11   :  { %62 = dma.hbm_to_vmem [thread:$0]  %s2923_s3, 128, %s60_s26, [#allocation13]  }
  0x12   :  { %s2504_s30 = smov [#allocation15]  }
  0x13   :  { %s82_s14 = sshll.u32 %s2504_s30, 4  ;;  %s83_s14 = int_to_ptr.vmem [resolvable:$true] %s82_s14 }
  0x14   :  { %s2331_s15 = scalar_lea.vmem %s83_s14, 6144  ;;  %p2336_p6 = scmp.lt.s32.totalorder %s83_s14, %s83_s14 }
  0x15   :  { %p2332_p5 = scmp.ne.s32.totalorder %s83_s14, %s2331_s15  ;;  %p2337_p7 = scmp.lt.s32.totalorder %s2331_s15, %s2331_s15 }
  0x17   :  { %p2338_p8 = por %p2337_p7, %p2336_p6 }
  0x19   :  { %p2339_p9 = pnand %p2338_p8, %p2332_p5 }
  0x1b   :  { %2342 = shalt.err (!%p2339_p9)
}
  0x1c   :  { %s2505_s16 = smov 128   ;;  %s2506_s17 = smov 8  }
  0x1d   :  { %88 = dma.hbm_to_vmem [thread:$0]  %s2926_s6, 6144, %s83_s14, [#allocation16], %s2505_s16, %s2505_s16, %s2506_s17  }
  0x1e   :  { %s2507_s3 = smov [#allocation5]   ;;  %s2508_s22 = smov [#allocation9]  }
  0x1f   :  { %34 = dma.hbm_to_smem %s2920_s0, 16, %s2507_s3, [#allocation8]  }
  0x20   :  { %42 = dma.hbm_to_smem %s2921_s1, 16, %s2508_s22, [#allocation10]  }
  0x21   :  { %s2509_s25 = smov [#allocation11]   ;;  %s2510_s27 = smov [#allocation14]  }
  0x22   :  { %s49_s26 = sshll.u32 %s2509_s25, 4  ;;  %s68_s28 = sshll.u32 %s2510_s27, 4  ;;  %s50_s26 = int_to_ptr.vmem [resolvable:$true] %s49_s26  ;;  %s69_s28 = int_to_ptr.vmem [resolvable:$true] %s68_s28 }
  0x23   :  { %s2367_s29 = scalar_lea.vmem %s50_s26, 128  ;;  %p2372_p11 = scmp.lt.s32.totalorder %s50_s26, %s50_s26 }
  0x24   :  { %p2368_p10 = scmp.ne.s32.totalorder %s50_s26, %s2367_s29  ;;  %p2373_p12 = scmp.lt.s32.totalorder %s2367_s29, %s2367_s29 }
  0x26   :  { %p2374_p13 = por %p2373_p12, %p2372_p11 }
  0x28   :  { %p2375_p0 = pnand %p2374_p13, %p2368_p10 }
  0x2a   :  { %2378 = shalt.err (!%p2375_p0)
}
  0x2b   :  { %52 = dma.hbm_to_vmem [thread:$0]  %s2922_s2, 128, %s50_s26, [#allocation6]  }
  0x2c   :  { %s2387_s30 = scalar_lea.vmem %s69_s28, 6144  ;;  %p2392_p2 = scmp.lt.s32.totalorder %s69_s28, %s69_s28 }
  0x2d   :  { %p2388_p1 = scmp.ne.s32.totalorder %s69_s28, %s2387_s30  ;;  %p2393_p3 = scmp.lt.s32.totalorder %s2387_s30, %s2387_s30 }
  0x2f   :  { %p2394_p4 = por %p2393_p3, %p2392_p2 }
  0x31   :  { %p2395_p5 = pnand %p2394_p4, %p2388_p1 }
  0x33   :  { %2398 = shalt.err (!%p2395_p5)
}
  0x34   :  { %74 = dma.hbm_to_vmem [thread:$0]  %s2924_s4, 6144, %s69_s28, [#allocation13], %s2505_s16, %s2505_s16, %s2506_s17  }
  0x35   :  { %s2511_s15 = smov [#allocation17]   ;;  %s2512_s19 = smov [#allocation18]  }
  0x36   :  { %s96_s18 = sshll.u32 %s2511_s15, 4  ;;  %s110_s3 = sshll.u32 %s2512_s19, 4  ;;  %s97_s18 = int_to_ptr.vmem [resolvable:$true] %s96_s18  ;;  %s111_s3 = int_to_ptr.vmem [resolvable:$true] %s110_s3 }
  0x37   :  { %s2407_s2 = scalar_lea.vmem %s97_s18, 6144  ;;  %p2412_p7 = scmp.lt.s32.totalorder %s97_s18, %s97_s18 }
  0x38   :  { %p2408_p6 = scmp.ne.s32.totalorder %s97_s18, %s2407_s2  ;;  %p2413_p8 = scmp.lt.s32.totalorder %s2407_s2, %s2407_s2 }
  0x3a   :  { %p2414_p9 = por %p2413_p8, %p2412_p7 }
  0x3c   :  { %p2415_p10 = pnand %p2414_p9, %p2408_p6 }
  0x3e   :  { %2418 = shalt.err (!%p2415_p10)
}
  0x3f   :  { %102 = dma.hbm_to_vmem [thread:$0]  %s2928_s8, 6144, %s97_s18, [#allocation16], %s2505_s16, %s2505_s16, %s2506_s17  }
  0x40   :  { %s2427_s4 = scalar_lea.vmem %s111_s3, 6144  ;;  %p2432_p12 = scmp.lt.s32.totalorder %s111_s3, %s111_s3 }
  0x41   :  { %p2428_p11 = scmp.ne.s32.totalorder %s111_s3, %s2427_s4  ;;  %p2433_p13 = scmp.lt.s32.totalorder %s2427_s4, %s2427_s4 }
  0x43   :  { %p2434_p0 = por %p2433_p13, %p2432_p12 }
  0x45   :  { %p2435_p1 = pnand %p2434_p0, %p2428_p11 }
  0x47   :  { %2438 = shalt.err (!%p2435_p1)
}
  0x48   :  { %116 = dma.hbm_to_vmem [thread:$0]  %s2930_s10, 6144, %s111_s3, [#allocation19], %s2505_s16, %s2505_s16, %s2506_s17  }
  0x49   :  { %2483 = dma.done.wait [#allocation8], 16  }
  0x4a   :  { %2484 = vsyncadd [#allocation8], 4294967280 }
  0x4b   :  { %2485 = dma.done.wait [#allocation10], 16  }
  0x4c   :  { %2486 = vsyncadd [#allocation10], 4294967280 }
  0x4d   :  { %2487 = dma.done.wait [#allocation6], 128  }
  0x4e   :  { %2488 = vsyncadd [#allocation6], 4294967168 }
  0x4f   :  { %2489 = dma.done.wait [#allocation13], 6272  }
  0x50   :  { %2490 = vsyncadd [#allocation13], 4294961024 }
  0x51   :  { %2491 = dma.done.wait [#allocation16], 12288  }
  0x52   :  { %2492 = vsyncadd [#allocation16], 4294955008 }
  0x53   :  { %2493 = dma.done.wait [#allocation19], 6144  }
  0x54   :  { %2494 = vsyncadd [#allocation19], 4294961152 }
  0x55   :  { %143 = sfence }
  0x56   :  { %v163_v0 = vld [vmem:[#allocation14 + $0x78] sm:$0xff]  ;;  %v2513_v1 = vmov 0.0   ;;  %v162_v2 = vld [vmem:[#allocation14 + $0x70] sm:$0xff]  ;;  %vm2514_vm0 = vmmov 0   ;;  %v161_v3 = vld [vmem:[#allocation14 + $0x68] sm:$0xff]  ;;  %s2515_s16 = smov 4  }
  0x57   :  { %1835 = vmatprep.subr.mxu0 %v2513_v1  ;;  %1867 = vmatprep.mubr.msk.f32.mxu0 %vm2514_vm0, %v2513_v1  ;;  %v160_v4 = vld [vmem:[#allocation14 + $0x60] sm:$0xff]  ;;  %v260_v5 = vld [vmem:[#allocation14 + $0xf8] sm:$0xff]  ;;  %v259_v6 = vld [vmem:[#allocation14 + $0xf0] sm:$0xff]  ;;  %s2516_s28 = smov 120   ;;  %vm465_vm8 = vcmask 64512  }
  0x58   :  { %1836 = vmatpush3.msra.mxu0 %v163_v0  ;;  %1870 = vmatprep.subr.mxu1 %v2513_v1  ;;  %v159_v7 = vld [vmem:[#allocation14 + $0x58] sm:$0xff]  ;;  %v258_v8 = vld [vmem:[#allocation14 + $0xe8] sm:$0xff]  ;;  %v158_v9 = vld [vmem:[#allocation14 + $0x50] sm:$0xff] }
  0x59   :  { %1837 = vmatprep.subr.mxu0 %v2513_v1  ;;  %1902 = vmatprep.mubr.msk.f32.mxu1 %vm2514_vm0, %v2513_v1  ;;  %v257_v10 = vld [vmem:[#allocation14 + $0xe0] sm:$0xff]  ;;  %v157_v11 = vld [vmem:[#allocation14 + $0x48] sm:$0xff]  ;;  %v256_v12 = vld [vmem:[#allocation14 + $0xd8] sm:$0xff] }
  0x5a   :  { %1838 = vmatpush3.msra.mxu0 %v162_v2  ;;  %1871 = vmatpush3.msra.mxu1 %v260_v5  ;;  %v156_v13 = vld [vmem:[#allocation14 + $0x40] sm:$0xff]  ;;  %v255_v14 = vld [vmem:[#allocation14 + $0xd0] sm:$0xff]  ;;  %v155_v15 = vld [vmem:[#allocation14 + $0x38] sm:$0xff] }
  0x5b   :  { %1839 = vmatprep.subr.mxu0 %v2513_v1  ;;  %1872 = vmatprep.subr.mxu1 %v2513_v1  ;;  %v254_v16 = vld [vmem:[#allocation14 + $0xc8] sm:$0xff]  ;;  %v154_v17 = vld [vmem:[#allocation14 + $0x30] sm:$0xff]  ;;  %v253_v18 = vld [vmem:[#allocation14 + $0xc0] sm:$0xff] }
  0x5c   :  { %1840 = vmatpush3.msra.mxu0 %v161_v3  ;;  %1873 = vmatpush3.msra.mxu1 %v259_v6  ;;  %v153_v19 = vld [vmem:[#allocation14 + $0x28] sm:$0xff]  ;;  %v252_v20 = vld [vmem:[#allocation14 + $0xb8] sm:$0xff]  ;;  %v152_v21 = vld [vmem:[#allocation14 + $0x20] sm:$0xff] }
  0x5d   :  { %1841 = vmatprep.subr.mxu0 %v2513_v1  ;;  %1874 = vmatprep.subr.mxu1 %v2513_v1  ;;  %v251_v22 = vld [vmem:[#allocation14 + $0xb0] sm:$0xff]  ;;  %v151_v24 = vld [vmem:[#allocation14 + $0x18] sm:$0xff]  ;;  %v250_v25 = vld [vmem:[#allocation14 + $0xa8] sm:$0xff] }
  0x5e   :  { %1842 = vmatpush3.msra.mxu0 %v160_v4  ;;  %1875 = vmatpush3.msra.mxu1 %v258_v8  ;;  %v144_v23 = vld [vmem:[#allocation11] sm:$0xff]  ;;  %v249_v28 = vld [vmem:[#allocation14 + $0xa0] sm:$0xff]  ;;  %v149_v29 = vld [vmem:[#allocation14 + $0x8] sm:$0xff] }
  0x5f   :  { %1843 = vmatprep.subr.mxu0 %v2513_v1  ;;  %1876 = vmatprep.subr.mxu1 %v2513_v1  ;;  %v150_v26 = vld [vmem:[#allocation14 + $0x10] sm:$0xff]  ;;  %v145_v27 = vadd.f32 1.0, %v144_v23  ;;  %v248_v30 = vld [vmem:[#allocation14 + $0x98] sm:$0xff]  ;;  %v148_v31 = vld [vmem:[#allocation14] sm:$0xff] }
  0x60   :  { %1844 = vmatpush3.msra.mxu0 %v159_v7  ;;  %1877 = vmatpush3.msra.mxu1 %v257_v10  ;;  %v247_v33 = vld [vmem:[#allocation14 + $0x90] sm:$0xff]  ;;  %v246_v34 = vld [vmem:[#allocation14 + $0x88] sm:$0xff]  ;;  %v245_v35 = vld [vmem:[#allocation14 + $0x80] sm:$0xff] }
  0x61   :  { %1845 = vmatprep.subr.mxu0 %v2513_v1  ;;  %1878 = vmatprep.subr.mxu1 %v2513_v1  ;;  %v2661_v32 = vmul.f32 0.5, %v145_v27  ;;  %v358_v36 = vld [vmem:[#allocation14 + $0x178] sm:$0xff]  ;;  %v357_v37 = vld [vmem:[#allocation14 + $0x170] sm:$0xff]  ;;  %v356_v38 = vld [vmem:[#allocation14 + $0x168] sm:$0xff] }
  0x62   :  { %1846 = vmatpush3.msra.mxu0 %v158_v9  ;;  %1879 = vmatpush3.msra.mxu1 %v256_v12  ;;  %v355_v39 = vld [vmem:[#allocation14 + $0x160] sm:$0xff]  ;;  %v354_v40 = vld [vmem:[#allocation14 + $0x158] sm:$0xff]  ;;  %v353_v41 = vld [vmem:[#allocation14 + $0x150] sm:$0xff] }
  0x63   :  { %1847 = vmatprep.subr.mxu0 %v2513_v1  ;;  %1880 = vmatprep.subr.mxu1 %v2513_v1  ;;  %v352_v42 = vld [vmem:[#allocation14 + $0x148] sm:$0xff]  ;;  %v351_v43 = vld [vmem:[#allocation14 + $0x140] sm:$0xff]  ;;  %v350_v44 = vld [vmem:[#allocation14 + $0x138] sm:$0xff] }
  0x64   :  { %1848 = vmatpush3.msra.mxu0 %v157_v11  ;;  %1881 = vmatpush3.msra.mxu1 %v255_v14  ;;  %v349_v45 = vld [vmem:[#allocation14 + $0x130] sm:$0xff]  ;;  %v348_v46 = vld [vmem:[#allocation14 + $0x128] sm:$0xff]  ;;  %v347_v47 = vld [vmem:[#allocation14 + $0x120] sm:$0xff] }
  0x65   :  { %1849 = vmatprep.subr.mxu0 %v2513_v1  ;;  %1882 = vmatprep.subr.mxu1 %v2513_v1  ;;  %v346_v48 = vld [vmem:[#allocation14 + $0x118] sm:$0xff]  ;;  %v1603_v49 = vld [vmem:[%s2925_s5] ss:$0 sm:$0xff]  ;;  %v344_v56 = vld [vmem:[#allocation14 + $0x108] sm:$0xff] }
  0x66   :  { %1850 = vmatpush3.msra.mxu0 %v156_v13  ;;  %1883 = vmatpush3.msra.mxu1 %v254_v16  ;;  %v345_v55 = vld [vmem:[#allocation14 + $0x110] sm:$0xff]  ;;  %v343_v57 = vld [vmem:[#allocation14 + $0x100] sm:$0xff]  ;;  %v2690_v58 = vld [vmem:[#allocation12] sm:$0xff]  ;;  %v440_v13 = vlaneseq }
  0x67   :  { %1851 = vmatprep.subr.mxu0 %v2513_v1  ;;  %1884 = vmatprep.subr.mxu1 %v2513_v1  ;;  %v1605_v59 = vld [vmem:[%s2925_s5 + $0x1] ss:$0 sm:$0xff]  ;;  %v1607_v2 = vld [vmem:[%s2925_s5 + $0x2] ss:$0 sm:$0xff]  ;;  %s2499_s5 = smov 0  }
  0x68   :  { %1852 = vmatpush3.msra.mxu0 %v155_v15  ;;  %1885 = vmatpush3.msra.mxu1 %v253_v18  ;;  %v2706_v14 = vand.u32 127, %v440_v13 }
  0x69   :  { %1853 = vmatprep.subr.mxu0 %v2513_v1  ;;  %1886 = vmatprep.subr.mxu1 %v2513_v1 }
  0x6a   :  { %1854 = vmatpush3.msra.mxu0 %v154_v17  ;;  %1887 = vmatpush3.msra.mxu1 %v252_v20  ;;  %vm443_vm4 = vcmp.ge.s32.totalorder %v2706_v14, 1  ;;  %vm444_vm5 = vcmp.lt.s32.totalorder %v2706_v14, 4  ;;  %vm442_vm7 = vcmp.eq.s32.totalorder %v2706_v14, 0 }
  0x6b   :  { %1855 = vmatprep.subr.mxu0 %v2513_v1  ;;  %1888 = vmatprep.subr.mxu1 %v2513_v1  ;;  %vm2710_vm6 = vmand %vm443_vm4, %vm444_vm5 }
  0x6c   :  { %1856 = vmatpush3.msra.mxu0 %v153_v19  ;;  %1889 = vmatpush3.msra.mxu1 %v251_v22 }
  0x6d   :  { %1857 = vmatprep.subr.mxu0 %v2513_v1  ;;  %1890 = vmatprep.subr.mxu1 %v2513_v1 }
  0x6e   :  { %1858 = vmatpush3.msra.mxu0 %v152_v21  ;;  %1891 = vmatpush3.msra.mxu1 %v250_v25 }
  0x6f   :  { %1859 = vmatprep.subr.mxu0 %v2513_v1  ;;  %1892 = vmatprep.subr.mxu1 %v2513_v1 }
  0x70   :  { %1860 = vmatpush3.msra.mxu0 %v151_v24  ;;  %1893 = vmatpush3.msra.mxu1 %v249_v28 }
  0x71   :  { %1861 = vmatprep.subr.mxu0 %v2513_v1  ;;  %1894 = vmatprep.subr.mxu1 %v2513_v1 }
  0x72   :  { %1862 = vmatpush3.msra.mxu0 %v150_v26  ;;  %1895 = vmatpush3.msra.mxu1 %v248_v30 }
  0x73   :  { %1863 = vmatprep.subr.mxu0 %v2513_v1  ;;  %1896 = vmatprep.subr.mxu1 %v2513_v1 }
  0x74   :  { %1864 = vmatpush3.msra.mxu0 %v149_v29  ;;  %1897 = vmatpush3.msra.mxu1 %v247_v33 }
  0x75   :  { %1865 = vmatprep.subr.mxu0 %v2513_v1  ;;  %1898 = vmatprep.subr.mxu1 %v2513_v1 }
  0x76   :  { %1866 = vmatpush3.msra.mxu0 %v148_v31  ;;  %1899 = vmatpush3.msra.mxu1 %v246_v34 }
  0x77   :  { %1868 = vmatmul.mubr.f32.vlgmr.msra.gmra.mxu0 %v2661_v32  ;;  %1905 = vmatprep.subr.mxu0 %v2513_v1 }
  0x78   :  { %1937 = vmatprep.mubr.msk.f32.mxu0 %vm2514_vm0, %v2513_v1  ;;  %1900 = vmatprep.subr.mxu1 %v2513_v1 }
  0x79   :  { %1901 = vmatpush3.msra.mxu1 %v245_v35  ;;  %1906 = vmatpush3.msra.mxu0 %v358_v36 }
  0x7a   :  { %1907 = vmatprep.subr.mxu0 %v2513_v1  ;;  %450 = vrot.lane.b32.xlu0 %v2690_v58, %s2515_s16 }
  0x7b   :  { %1908 = vmatpush3.msra.mxu0 %v357_v37 }
  0x7c   :  { %1909 = vmatprep.subr.mxu0 %v2513_v1 }
  0x7d   :  { %1910 = vmatpush3.msra.mxu0 %v356_v38 }
  0x7e   :  { %1911 = vmatprep.subr.mxu0 %v2513_v1 }
  0x7f   :  { %1912 = vmatpush3.msra.mxu0 %v355_v39 }
  0x80   :  { %1913 = vmatprep.subr.mxu0 %v2513_v1 }
  0x81   :  { %1914 = vmatpush3.msra.mxu0 %v354_v40 }
  0x82   :  { %1915 = vmatprep.subr.mxu0 %v2513_v1 }
  0x83   :  { %1916 = vmatpush3.msra.mxu0 %v353_v41 }
  0x84   :  { %1917 = vmatprep.subr.mxu0 %v2513_v1 }
  0x85   :  { %1918 = vmatpush3.msra.mxu0 %v352_v42 }
  0x86   :  { %1919 = vmatprep.subr.mxu0 %v2513_v1 }
  0x87   :  { %1920 = vmatpush3.msra.mxu0 %v351_v43 }
  0x88   :  { %1921 = vmatprep.subr.mxu0 %v2513_v1 }
  0x89   :  { %1922 = vmatpush3.msra.mxu0 %v350_v44 }
  0x8a   :  { %1923 = vmatprep.subr.mxu0 %v2513_v1 }
  0x8b   :  { %1924 = vmatpush3.msra.mxu0 %v349_v45 }
  0x8c   :  { %1925 = vmatprep.subr.mxu0 %v2513_v1 }
  0x8d   :  { %1926 = vmatpush3.msra.mxu0 %v348_v46 }
  0x8e   :  { %1927 = vmatprep.subr.mxu0 %v2513_v1 }
  0x8f   :  { %1928 = vmatpush3.msra.mxu0 %v347_v47 }
  0x90   :  { %1929 = vmatprep.subr.mxu0 %v2513_v1 }
  0x91   :  { %1930 = vmatpush3.msra.mxu0 %v346_v48 }
  0x92   :  { %1931 = vmatprep.subr.mxu0 %v2513_v1 }
  0x93   :  { %1932 = vmatpush3.msra.mxu0 %v345_v55 }
  0x94   :  { %1933 = vmatprep.subr.mxu0 %v2513_v1 }
  0x95   :  { %1934 = vmatpush3.msra.mxu0 %v344_v56 }
  0x96   :  { %1935 = vmatprep.subr.mxu0 %v2513_v1 }
  0x97   :  { %1936 = vmatpush3.msra.mxu0 %v343_v57 }
  0xec   :  { %v451_v10 = vpop.permute.xlu0 %450 }
 0x137   :  { %v237_v50 = vpop.f32.mrf.mxu0 }
 0x138   :  { %v238_v51 = vadd.f32 %v1603_v49, %v237_v50 }
 0x139   :  { %v1869_v52 = vpop.f32.mrf.mxu0 }
 0x13a   :  { %v242_v53 = vmul.f32 0.01, %v238_v51  ;;  %vm241_vm1 = vcmp.ge.f32.partialorder %v238_v51, 0.0 }
 0x13c   :  { %v243_v54 = vsel %vm241_vm1, %v238_v51, %v242_v53 }
 0x13d   :  { %1903 = vmatmul.mubr.f32.vlgmr.msra.gmra.mxu1 %v243_v54 }
 0x1fd   :  { %v335_v60 = vpop.f32.mrf.mxu1 }
 0x1fe   :  { %v336_v61 = vadd.f32 %v1605_v59, %v335_v60 }
 0x1ff   :  { %v1904_v62 = vpop.f32.mrf.mxu1 }
 0x200   :  { %vm339_vm2 = vcmp.ge.f32.partialorder %v336_v61, 0.0  ;;  %v340_v63 = vmul.f32 0.01, %v336_v61 }
 0x202   :  { %v341_v0 = vsel %vm339_vm2, %v336_v61, %v340_v63 }
 0x203   :  { %1938 = vmatmul.mubr.f32.vlgmr.msra.gmra.mxu0 %v341_v0 }
 0x2c3   :  { %v433_v3 = vpop.f32.mrf.mxu0 }
 0x2c4   :  { %v434_v4 = vadd.f32 %v1607_v2, %v433_v3 }
 0x2c5   :  { %v1939_v5 = vpop.f32.mrf.mxu0 }
 0x2c6   :  { %vm437_vm3 = vcmp.ge.f32.partialorder %v434_v4, 0.0  ;;  %v438_v6 = vmul.f32 0.01, %v434_v4 }
 0x2c8   :  { %v2699_v7 = vsel %vm437_vm3, %v434_v4, %v438_v6 }
 0x2c9   :  { %v446_v8 = vmul.f32 0.5, %v2699_v7 }
 0x2cb   :  { %v447_v9 = vmul.f32 1.442695, %v446_v8 }
 0x2cd   :  { %2284 = vpow2.f32 %v447_v9 }
 0x2da   :  { %v2702_v11 = vpop.eup %2284 }
 0x2db   :  { %v453_v12 = vmul.f32 %v2702_v11, %v451_v10 }
 0x2dd   :  { %455 = vrot.lane.b32.xlu0 %v453_v12, %s2516_s28 }
 0x34f   :  { %v456_v16 = vpop.permute.xlu0 %455 }
 0x350   :  { %v458_v17 = vadd.f32 %v456_v16, %v2699_v7 }
 0x352   :  { %v461_v18 = vsel %vm2710_vm6, %v458_v17, 0.0 }
 0x353   :  { %v2721_v19 = vsel %vm442_vm7, %v2699_v7, %v461_v18 }
 0x354   :  { %v466_v20 = vsel %vm465_vm8, %v2721_v19, 0.0 }
 0x355   :  { %467 = vst [vmem:[#allocation2] sm:$0xff] %v466_v20 }
 0x356 LB: > { %s474_s29 = sld [smem:[#allocation5 + %s2501_s5]]  ;;  %s478_s30 = scalar_lea.vmem [#allocation3], %s2501_s5  ;;  %s2501_s5 = sphi %s2499_s5, %s473_s5  }
 0x357   : > { %s475_s6 = sld [smem:[#allocation9 + %s2501_s5]]  ;;  %s482_s14 = scalar_lea.vmem [#allocation4], %s2501_s5 }
 0x358   : > { %s473_s5 = sadd.s32 1, %s2501_s5  }
 0x359   : > { %p470_p2 = scmp.ge.s32.totalorder %s473_s5, 8  }
 0x35a   :  { %1940 = vmatprep.subr.mxu1 (%p470_p2), %v2513_v1  ;;  %v502_v23 = vld [vmem:[#allocation15 + $0x78] sm:$0xff] (%p470_p2)  ;;  %v501_v24 = vld [vmem:[#allocation15 + $0x70] sm:$0xff] (%p470_p2)  ;;  %1972 = vmatprep.mubr.msk.f32.mxu1 (%p470_p2), %vm2514_vm0, %v2513_v1  ;;  %v500_v25 = vld [vmem:[#allocation15 + $0x68] sm:$0xff] (%p470_p2)  ;;  %v2517_v60 = vmov (%p470_p2), 1   ;;  %vm1168_vm1 = vcmask (%p470_p2), 15360   ;;  %vm1203_vm5 = vcmask (%p470_p2), 15368  }
 0x35b   :  { %472 = sbr.rel (!%p470_p2) target bundleno = 854 (0x356), region = 135  ;;  %1941 = vmatpush3.msra.mxu1 (%p470_p2), %v502_v23  ;;  %1975 = vmatprep.subr.mxu0 (%p470_p2), %v2513_v1  ;;  %v499_v26 = vld [vmem:[#allocation15 + $0x60] sm:$0xff] (%p470_p2)  ;;  %v599_v27 = vld [vmem:[#allocation15 + $0xf8] sm:$0xff] (%p470_p2)  ;;  %v598_v28 = vld [vmem:[#allocation15 + $0xf0] sm:$0xff] (%p470_p2)  ;;  %s2522_s5 = smov (%p470_p2), [#allocation20]  }
 0x35c   : > { %s476_s0 = scalar_lea.vmem [#allocation2], %s474_s29  ;;  %1942 = vmatprep.subr.mxu1 (%p470_p2), %v2513_v1  ;;  %2007 = vmatprep.mubr.msk.f32.mxu0 (%p470_p2), %vm2514_vm0, %v2513_v1  ;;  %v498_v29 = vld [vmem:[#allocation15 + $0x58] sm:$0xff] (%p470_p2)  ;;  %v597_v30 = vld [vmem:[#allocation15 + $0xe8] sm:$0xff] (%p470_p2)  ;;  %v497_v31 = vld [vmem:[#allocation15 + $0x50] sm:$0xff] (%p470_p2)  ;;  %s1566_s29 = sshll.u32 (%p470_p2), %s2522_s5, 4  ;;  %s1567_s29 = int_to_ptr.vmem [resolvable:$true] %s1566_s29 }
 0x35d   : > { %v477_v21 = vld [vmem:[%s476_s0] sm:$0x1]  ;;  %s480_s1 = scalar_lea.vmem [#allocation2], %s475_s6  ;;  %1943 = vmatpush3.msra.mxu1 (%p470_p2), %v501_v24  ;;  %1976 = vmatpush3.msra.mxu0 (%p470_p2), %v599_v27  ;;  %v596_v33 = vld [vmem:[#allocation15 + $0xe0] sm:$0xff] (%p470_p2)  ;;  %v496_v34 = vld [vmem:[#allocation15 + $0x48] sm:$0xff] (%p470_p2)  ;;  %s2439_s6 = scalar_lea.vmem (%p470_p2), %s1567_s29, 128 }
 0x35e   : > { %479 = vst [vmem:[%s478_s30] sm:$0x1] %v477_v21  ;;  %v481_v22 = vld [vmem:[%s480_s1] sm:$0x1]  ;;  %1944 = vmatprep.subr.mxu1 (%p470_p2), %v2513_v1  ;;  %1977 = vmatprep.subr.mxu0 (%p470_p2), %v2513_v1  ;;  %v595_v35 = vld [vmem:[#allocation15 + $0xd8] sm:$0xff] (%p470_p2)  ;;  %v495_v36 = vld [vmem:[#allocation15 + $0x40] sm:$0xff] (%p470_p2)  ;;  %p2440_p3 = scmp.ne.s32.totalorder (%p470_p2), %s1567_s29, %s2439_s6  ;;  %p2444_p4 = scmp.lt.s32.totalorder (%p470_p2), %s1567_s29, %s1567_s29 }
 0x35f   : > { %483 = vst [vmem:[%s482_s14] sm:$0x1] %v481_v22  ;;  %1945 = vmatpush3.msra.mxu1 (%p470_p2), %v500_v25  ;;  %1978 = vmatpush3.msra.mxu0 (%p470_p2), %v598_v28  ;;  %v594_v37 = vld [vmem:[#allocation15 + $0xd0] sm:$0xff] (%p470_p2)  ;;  %v494_v38 = vld [vmem:[#allocation15 + $0x38] sm:$0xff] (%p470_p2)  ;;  %v593_v39 = vld [vmem:[#allocation15 + $0xc8] sm:$0xff] (%p470_p2)  ;;  %p2445_p5 = scmp.lt.s32.totalorder (%p470_p2), %s2439_s6, %s2439_s6 }
 0x360   :  { %1946 = vmatprep.subr.mxu1 %v2513_v1  ;;  %1979 = vmatprep.subr.mxu0 %v2513_v1  ;;  %v493_v40 = vld [vmem:[#allocation15 + $0x30] sm:$0xff]  ;;  %v592_v41 = vld [vmem:[#allocation15 + $0xc0] sm:$0xff]  ;;  %v492_v42 = vld [vmem:[#allocation15 + $0x28] sm:$0xff] }
 0x361   :  { %1947 = vmatpush3.msra.mxu1 %v499_v26  ;;  %1980 = vmatpush3.msra.mxu0 %v597_v30  ;;  %v591_v43 = vld [vmem:[#allocation15 + $0xb8] sm:$0xff]  ;;  %v491_v44 = vld [vmem:[#allocation15 + $0x20] sm:$0xff]  ;;  %v590_v45 = vld [vmem:[#allocation15 + $0xb0] sm:$0xff]  ;;  %p2446_p6 = por %p2445_p5, %p2444_p4 }
 0x362   :  { %1948 = vmatprep.subr.mxu1 %v2513_v1  ;;  %1981 = vmatprep.subr.mxu0 %v2513_v1  ;;  %v490_v46 = vld [vmem:[#allocation15 + $0x18] sm:$0xff]  ;;  %v589_v47 = vld [vmem:[#allocation15 + $0xa8] sm:$0xff]  ;;  %v489_v48 = vld [vmem:[#allocation15 + $0x10] sm:$0xff] }
 0x363   :  { %1949 = vmatpush3.msra.mxu1 %v498_v29  ;;  %1982 = vmatpush3.msra.mxu0 %v596_v33  ;;  %v588_v49 = vld [vmem:[#allocation15 + $0xa0] sm:$0xff]  ;;  %v488_v50 = vld [vmem:[#allocation15 + $0x8] sm:$0xff]  ;;  %v587_v51 = vld [vmem:[#allocation15 + $0x98] sm:$0xff]  ;;  %p2447_p7 = pnand %p2446_p6, %p2440_p3 }
 0x364   :  { %1950 = vmatprep.subr.mxu1 %v2513_v1  ;;  %1983 = vmatprep.subr.mxu0 %v2513_v1  ;;  %v487_v52 = vld [vmem:[#allocation15] sm:$0xff]  ;;  %v586_v53 = vld [vmem:[#allocation15 + $0x90] sm:$0xff]  ;;  %v585_v54 = vld [vmem:[#allocation15 + $0x88] sm:$0xff] }
 0x365   :  { %1951 = vmatpush3.msra.mxu1 %v497_v31  ;;  %1984 = vmatpush3.msra.mxu0 %v595_v35  ;;  %v584_v55 = vld [vmem:[#allocation15 + $0x80] sm:$0xff]  ;;  %v850_v56 = vld [vmem:[#allocation17 + $0x78] sm:$0xff]  ;;  %v696_v59 = vld [vmem:[#allocation15 + $0x170] sm:$0xff] }
 0x366   :  { %1952 = vmatprep.subr.mxu1 %v2513_v1  ;;  %1985 = vmatprep.subr.mxu0 %v2513_v1  ;;  %v697_v57 = vld [vmem:[#allocation15 + $0x178] sm:$0xff]  ;;  %v695_v61 = vld [vmem:[#allocation15 + $0x168] sm:$0xff]  ;;  %v694_v62 = vld [vmem:[#allocation15 + $0x160] sm:$0xff] }
 0x367   :  { %1953 = vmatpush3.msra.mxu1 %v496_v34  ;;  %1986 = vmatpush3.msra.mxu0 %v594_v37  ;;  %v693_v63 = vld [vmem:[#allocation15 + $0x158] sm:$0xff]  ;;  %v692_v0 = vld [vmem:[#allocation15 + $0x150] sm:$0xff]  ;;  %v691_v2 = vld [vmem:[#allocation15 + $0x148] sm:$0xff] }
 0x368   :  { %1954 = vmatprep.subr.mxu1 %v2513_v1  ;;  %1987 = vmatprep.subr.mxu0 %v2513_v1  ;;  %v690_v3 = vld [vmem:[#allocation15 + $0x140] sm:$0xff]  ;;  %v689_v4 = vld [vmem:[#allocation15 + $0x138] sm:$0xff]  ;;  %v688_v5 = vld [vmem:[#allocation15 + $0x130] sm:$0xff] }
 0x369   :  { %1955 = vmatpush3.msra.mxu1 %v495_v36  ;;  %1988 = vmatpush3.msra.mxu0 %v593_v39  ;;  %v687_v6 = vld [vmem:[#allocation15 + $0x128] sm:$0xff]  ;;  %v686_v8 = vld [vmem:[#allocation15 + $0x120] sm:$0xff]  ;;  %v685_v9 = vld [vmem:[#allocation15 + $0x118] sm:$0xff] }
 0x36a   :  { %1956 = vmatprep.subr.mxu1 %v2513_v1  ;;  %1989 = vmatprep.subr.mxu0 %v2513_v1  ;;  %v1608_v10 = vld [vmem:[%s2927_s7] ss:$0 sm:$0xff]  ;;  %v848_v21 = vld [vmem:[#allocation17 + $0x68] sm:$0xff]  ;;  %v847_v22 = vld [vmem:[#allocation17 + $0x60] sm:$0xff] }
 0x36b   :  { %1957 = vmatpush3.msra.mxu1 %v494_v38  ;;  %1990 = vmatpush3.msra.mxu0 %v592_v41  ;;  %v849_v20 = vld [vmem:[#allocation17 + $0x70] sm:$0xff]  ;;  %v846_v23 = vld [vmem:[#allocation17 + $0x58] sm:$0xff]  ;;  %v844_v25 = vld [vmem:[#allocation17 + $0x48] sm:$0xff] }
 0x36c   :  { %1958 = vmatprep.subr.mxu1 %v2513_v1  ;;  %1991 = vmatprep.subr.mxu0 %v2513_v1  ;;  %v845_v24 = vld [vmem:[#allocation17 + $0x50] sm:$0xff]  ;;  %v843_v26 = vld [vmem:[#allocation17 + $0x40] sm:$0xff]  ;;  %v842_v27 = vld [vmem:[#allocation17 + $0x38] sm:$0xff] }
 0x36d   :  { %1959 = vmatpush3.msra.mxu1 %v493_v40  ;;  %1992 = vmatpush3.msra.mxu0 %v591_v43  ;;  %v840_v28 = vld [vmem:[#allocation17 + $0x28] sm:$0xff]  ;;  %v839_v29 = vld [vmem:[#allocation17 + $0x20] sm:$0xff]  ;;  %v838_v30 = vld [vmem:[#allocation17 + $0x18] sm:$0xff] }
 0x36e   :  { %1960 = vmatprep.subr.mxu1 %v2513_v1  ;;  %1993 = vmatprep.subr.mxu0 %v2513_v1  ;;  %v837_v31 = vld [vmem:[#allocation17 + $0x10] sm:$0xff]  ;;  %v836_v33 = vld [vmem:[#allocation17 + $0x8] sm:$0xff]  ;;  %v484_v34 = vld [vmem:[#allocation3] sm:$0xff] }
 0x36f   :  { %1961 = vmatpush3.msra.mxu1 %v492_v42  ;;  %1994 = vmatpush3.msra.mxu0 %v590_v45  ;;  %v485_v35 = vld [vmem:[#allocation4] sm:$0xff]  ;;  %v835_v36 = vld [vmem:[#allocation17] sm:$0xff]  ;;  %v684_v38 = vld [vmem:[#allocation15 + $0x110] sm:$0xff] }
 0x370   :  { %1962 = vmatprep.subr.mxu1 %v2513_v1  ;;  %1995 = vmatprep.subr.mxu0 %v2513_v1  ;;  %v486_v37 = vsel %vm442_vm7, %v484_v34, %v485_v35  ;;  %v683_v39 = vld [vmem:[#allocation15 + $0x108] sm:$0xff]  ;;  %v682_v40 = vld [vmem:[#allocation15 + $0x100] sm:$0xff]  ;;  %v955_v41 = vld [vmem:[#allocation17 + $0xf8] sm:$0xff] }
 0x371   :  { %1963 = vmatpush3.msra.mxu1 %v491_v44  ;;  %1996 = vmatpush3.msra.mxu0 %v589_v47  ;;  %v1611_v42 = vld [vmem:[%s2927_s7 + $0x1] ss:$0 sm:$0xff]  ;;  %v1059_v35 = vld [vmem:[#allocation17 + $0x168] sm:$0xff]  ;;  %v1057_v14 = vld [vmem:[#allocation17 + $0x158] sm:$0xff] }
 0x372   :  { %1964 = vmatprep.subr.mxu1 %v2513_v1  ;;  %1997 = vmatprep.subr.mxu0 %v2513_v1  ;;  %v1060_v34 = vld [vmem:[#allocation17 + $0x170] sm:$0xff] }
 0x373   :  { %1965 = vmatpush3.msra.mxu1 %v490_v46  ;;  %1998 = vmatpush3.msra.mxu0 %v588_v49  ;;  %v953_v49 = vld [vmem:[#allocation17 + $0xe8] sm:$0xff] }
 0x374   :  { %1966 = vmatprep.subr.mxu1 %v2513_v1  ;;  %1999 = vmatprep.subr.mxu0 %v2513_v1 }
 0x375   :  { %1967 = vmatpush3.msra.mxu1 %v489_v48  ;;  %2000 = vmatpush3.msra.mxu0 %v587_v51  ;;  %v954_v48 = vld [vmem:[#allocation17 + $0xf0] sm:$0xff]  ;;  %v951_v51 = vld [vmem:[#allocation17 + $0xd8] sm:$0xff] }
 0x376   :  { %1968 = vmatprep.subr.mxu1 %v2513_v1  ;;  %2001 = vmatprep.subr.mxu0 %v2513_v1 }
 0x377   :  { %1969 = vmatpush3.msra.mxu1 %v488_v50  ;;  %2002 = vmatpush3.msra.mxu0 %v586_v53  ;;  %v952_v50 = vld [vmem:[#allocation17 + $0xe0] sm:$0xff]  ;;  %v949_v53 = vld [vmem:[#allocation17 + $0xc8] sm:$0xff] }
 0x378   :  { %1970 = vmatprep.subr.mxu1 %v2513_v1  ;;  %2003 = vmatprep.subr.mxu0 %v2513_v1 }
 0x379   :  { %1971 = vmatpush3.msra.mxu1 %v487_v52  ;;  %2004 = vmatpush3.msra.mxu0 %v585_v54  ;;  %v950_v52 = vld [vmem:[#allocation17 + $0xd0] sm:$0xff]  ;;  %v948_v54 = vld [vmem:[#allocation17 + $0xc0] sm:$0xff] }
 0x37a   :  { %1973 = vmatmul.mubr.msk.f32.vlgmr.msra.gmra.mxu1 %vm465_vm8, %v2721_v19  ;;  %2010 = vmatprep.subr.mxu1 %v2513_v1 }
 0x37b   :  { %2042 = vmatprep.mubr.msk.f32.mxu1 %vm2514_vm0, %v2513_v1  ;;  %2005 = vmatprep.subr.mxu0 %v2513_v1 }
 0x37c   :  { %2006 = vmatpush3.msra.mxu0 %v584_v55  ;;  %2286 = vset.pattern.permute.xlu0 %v2517_v60  ;;  %v947_v55 = vld [vmem:[#allocation17 + $0xb8] sm:$0xff] }
 0x37d   :  { %2045 = vmatprep.subr.mxu0 %v850_v56  ;;  %2011 = vmatpush3.msra.mxu1 %v697_v57  ;;  %v945_v57 = vld [vmem:[#allocation17 + $0xa8] sm:$0xff]  ;;  %v943_v60 = vld [vmem:[#allocation17 + $0x98] sm:$0xff] }
 0x37e   :  { %1219 = vperm.xlu0 %2286, %v2690_v58   ;;  %2012 = vmatprep.subr.mxu1 %v2513_v1 }
 0x37f   :  { %2013 = vmatpush3.msra.mxu1 %v696_v59  ;;  %v944_v59 = vld [vmem:[#allocation17 + $0xa0] sm:$0xff] }
 0x380   :  { %2014 = vmatprep.subr.mxu1 %v2513_v1 }
 0x381   :  { %2015 = vmatpush3.msra.mxu1 %v695_v61  ;;  %v942_v61 = vld [vmem:[#allocation17 + $0x90] sm:$0xff] }
 0x382   :  { %2016 = vmatprep.subr.mxu1 %v2513_v1 }
 0x383   :  { %2017 = vmatpush3.msra.mxu1 %v694_v62  ;;  %v1616_v62 = vld [vmem:[%s2929_s9] ss:$0 sm:$0xff] }
 0x384   :  { %2018 = vmatprep.subr.mxu1 %v2513_v1 }
 0x385   :  { %2019 = vmatpush3.msra.mxu1 %v693_v63  ;;  %v941_v63 = vld [vmem:[#allocation17 + $0x88] sm:$0xff] }
 0x386   :  { %2020 = vmatprep.subr.mxu1 %v2513_v1 }
 0x387   :  { %2021 = vmatpush3.msra.mxu1 %v692_v0 }
 0x388   :  { %2022 = vmatprep.subr.mxu1 %v2513_v1 }
 0x389   :  { %2023 = vmatpush3.msra.mxu1 %v691_v2 }
 0x38a   :  { %2024 = vmatprep.subr.mxu1 %v2513_v1 }
 0x38b   :  { %2025 = vmatpush3.msra.mxu1 %v690_v3  ;;  %v940_v3 = vld [vmem:[#allocation17 + $0x80] sm:$0xff] }
 0x38c   :  { %2026 = vmatprep.subr.mxu1 %v2513_v1 }
 0x38d   :  { %2027 = vmatpush3.msra.mxu1 %v689_v4 }
 0x38e   :  { %2028 = vmatprep.subr.mxu1 %v2513_v1 }
 0x38f   :  { %2029 = vmatpush3.msra.mxu1 %v688_v5 }
 0x390   :  { %2030 = vmatprep.subr.mxu1 %v2513_v1 }
 0x391   :  { %2031 = vmatpush3.msra.mxu1 %v687_v6 }
 0x392   :  { %2032 = vmatprep.subr.mxu1 %v2513_v1 }
 0x393   :  { %2033 = vmatpush3.msra.mxu1 %v686_v8 }
 0x394   :  { %2034 = vmatprep.subr.mxu1 %v2513_v1 }
 0x395   :  { %2035 = vmatpush3.msra.mxu1 %v685_v9 }
 0x396   :  { %2036 = vmatprep.subr.mxu1 %v2513_v1 }
 0x397   :  { %2037 = vmatpush3.msra.mxu1 %v684_v38  ;;  %v1055_v38 = vld [vmem:[#allocation17 + $0x148] sm:$0xff] }
 0x398   :  { %2038 = vmatprep.subr.mxu1 %v2513_v1 }
 0x399   :  { %2039 = vmatpush3.msra.mxu1 %v683_v39  ;;  %v1054_v39 = vld [vmem:[#allocation17 + $0x140] sm:$0xff] }
 0x39a   :  { %2040 = vmatprep.subr.mxu1 %v2513_v1 }
 0x39b   :  { %2041 = vmatpush3.msra.mxu1 %v682_v40  ;;  %v1053_v40 = vld [vmem:[#allocation17 + $0x138] sm:$0xff] }
 0x39c   :  { %2080 = vmatprep.subr.mxu1 %v955_v41 }
 0x43a   :  { %v576_v12 = vpop.f32.mrf.mxu1 }
 0x43b   :  { %v577_v13 = vadd.f32 %v1608_v10, %v576_v12  ;;  %v1239_v10 = vld [vmem:[#allocation18 + $0x78] sm:$0xff] }
 0x43c   :  { %v1974_v16 = vpop.f32.mrf.mxu1 }
 0x43d   :  { %v581_v17 = vmul.f32 0.01, %v577_v13  ;;  %vm580_vm9 = vcmp.ge.f32.partialorder %v577_v13, 0.0  ;;  %v1237_v16 = vld [vmem:[#allocation18 + $0x68] sm:$0xff] }
 0x43f   :  { %v582_v18 = vsel %vm580_vm9, %v577_v13, %v581_v17  ;;  %v1238_v13 = vld [vmem:[#allocation18 + $0x70] sm:$0xff]  ;;  %v1236_v17 = vld [vmem:[#allocation18 + $0x60] sm:$0xff]  ;;  %vm783_vm9 = vcmask 130048  }
 0x440   :  { %2008 = vmatmul.mubr.f32.vlgmr.msra.gmra.mxu0 %v582_v18  ;;  %v1235_v18 = vld [vmem:[#allocation18 + $0x58] sm:$0xff] }
 0x441   :  { %2046 = vmatpush3.msra.mxu0 %v850_v56  ;;  %2077 = vmatprep.mubr.msk.f32.mxu0 %vm465_vm8, %v2721_v19  ;;  %v841_v19 = vld [vmem:[#allocation17 + $0x30] sm:$0xff] }
 0x442   :  { %2047 = vmatprep.subr.mxu0 %v849_v20  ;;  %v946_v56 = vld [vmem:[#allocation17 + $0xb0] sm:$0xff] }
 0x443   :  { %2048 = vmatpush3.msra.mxu0 %v849_v20  ;;  %v1234_v20 = vld [vmem:[#allocation18 + $0x50] sm:$0xff] }
 0x444   :  { %2049 = vmatprep.subr.mxu0 %v848_v21 }
 0x445   :  { %2050 = vmatpush3.msra.mxu0 %v848_v21  ;;  %v1233_v21 = vld [vmem:[#allocation18 + $0x48] sm:$0xff] }
 0x446   :  { %2051 = vmatprep.subr.mxu0 %v847_v22 }
 0x447   :  { %2052 = vmatpush3.msra.mxu0 %v847_v22  ;;  %v1232_v22 = vld [vmem:[#allocation18 + $0x40] sm:$0xff] }
 0x448   :  { %2053 = vmatprep.subr.mxu0 %v846_v23 }
 0x449   :  { %2054 = vmatpush3.msra.mxu0 %v846_v23  ;;  %v1231_v23 = vld [vmem:[#allocation18 + $0x38] sm:$0xff] }
 0x44a   :  { %2055 = vmatprep.subr.mxu0 %v845_v24 }
 0x44b   :  { %2056 = vmatpush3.msra.mxu0 %v845_v24  ;;  %v1230_v24 = vld [vmem:[#allocation18 + $0x30] sm:$0xff] }
 0x44c   :  { %2057 = vmatprep.subr.mxu0 %v844_v25 }
 0x44d   :  { %2058 = vmatpush3.msra.mxu0 %v844_v25  ;;  %v1229_v25 = vld [vmem:[#allocation18 + $0x28] sm:$0xff] }
 0x44e   :  { %2059 = vmatprep.subr.mxu0 %v843_v26 }
 0x44f   :  { %2060 = vmatpush3.msra.mxu0 %v843_v26  ;;  %v1228_v26 = vld [vmem:[#allocation18 + $0x20] sm:$0xff] }
 0x450   :  { %2061 = vmatprep.subr.mxu0 %v842_v27 }
 0x451   :  { %2062 = vmatpush3.msra.mxu0 %v842_v27  ;;  %v1227_v27 = vld [vmem:[#allocation18 + $0x18] sm:$0xff] }
 0x452   :  { %2063 = vmatprep.subr.mxu0 %v841_v19 }
 0x453   :  { %2064 = vmatpush3.msra.mxu0 %v841_v19  ;;  %v1226_v19 = vld [vmem:[#allocation18 + $0x10] sm:$0xff] }
 0x454   :  { %2065 = vmatprep.subr.mxu0 %v840_v28 }
 0x455   :  { %2066 = vmatpush3.msra.mxu0 %v840_v28  ;;  %v1225_v28 = vld [vmem:[#allocation18 + $0x8] sm:$0xff] }
 0x456   :  { %2067 = vmatprep.subr.mxu0 %v839_v29 }
 0x457   :  { %2068 = vmatpush3.msra.mxu0 %v839_v29  ;;  %v1220_v29 = vpop.permute.xlu0 %1219 }
 0x458   :  { %2069 = vmatprep.subr.mxu0 %v838_v30 }
 0x459   :  { %2070 = vmatpush3.msra.mxu0 %v838_v30  ;;  %v1224_v30 = vld [vmem:[#allocation18] sm:$0xff] }
 0x45a   :  { %2071 = vmatprep.subr.mxu0 %v837_v31 }
 0x45b   :  { %2072 = vmatpush3.msra.mxu0 %v837_v31  ;;  %v1222_v31 = vsel %vm442_vm7, %v1220_v29, %v2699_v7  ;;  %v1428_v29 = vld [vmem:[#allocation18 + $0x148] sm:$0xff] }
 0x45c   :  { %2073 = vmatprep.subr.mxu0 %v836_v33 }
 0x45d   :  { %2074 = vmatpush3.msra.mxu0 %v836_v33  ;;  %v1061_v33 = vld [vmem:[#allocation17 + $0x178] sm:$0xff] }
 0x45e   :  { %2075 = vmatprep.subr.mxu0 %v835_v36 }
 0x45f   :  { %2076 = vmatpush3.msra.mxu0 %v835_v36  ;;  %v1058_v36 = vld [vmem:[#allocation17 + $0x160] sm:$0xff] }
 0x460   :  { %2078 = vmatmul.mubr.f32.vlgmr.msra.gmra.mxu0 %v486_v37  ;;  %2115 = vmatprep.subr.mxu0 %v1061_v33  ;;  %v1056_v37 = vld [vmem:[#allocation17 + $0x150] sm:$0xff] }
 0x461   :  { %2116 = vmatpush3.msra.mxu0 %v1061_v33  ;;  %v1425_v33 = vld [vmem:[#allocation18 + $0x130] sm:$0xff] }
 0x462   :  { %2117 = vmatprep.subr.mxu0 %v1060_v34 }
 0x463   :  { %2118 = vmatpush3.msra.mxu0 %v1060_v34  ;;  %v1424_v34 = vld [vmem:[#allocation18 + $0x128] sm:$0xff] }
 0x464   :  { %2119 = vmatprep.subr.mxu0 %v1059_v35 }
 0x465   :  { %2120 = vmatpush3.msra.mxu0 %v1059_v35  ;;  %v1423_v35 = vld [vmem:[#allocation18 + $0x120] sm:$0xff] }
 0x466   :  { %2121 = vmatprep.subr.mxu0 %v1058_v36 }
 0x467   :  { %2122 = vmatpush3.msra.mxu0 %v1058_v36  ;;  %v1422_v36 = vld [vmem:[#allocation18 + $0x118] sm:$0xff] }
 0x468   :  { %2123 = vmatprep.subr.mxu0 %v1057_v14 }
 0x469   :  { %2124 = vmatpush3.msra.mxu0 %v1057_v14  ;;  %v1421_v14 = vld [vmem:[#allocation18 + $0x110] sm:$0xff] }
 0x46a   :  { %2125 = vmatprep.subr.mxu0 %v1056_v37 }
 0x46b   :  { %2126 = vmatpush3.msra.mxu0 %v1056_v37  ;;  %v1420_v37 = vld [vmem:[#allocation18 + $0x108] sm:$0xff] }
 0x46c   :  { %2127 = vmatprep.subr.mxu0 %v1055_v38 }
 0x46d   :  { %2128 = vmatpush3.msra.mxu0 %v1055_v38  ;;  %v1419_v38 = vld [vmem:[#allocation18 + $0x100] sm:$0xff] }
 0x46e   :  { %2129 = vmatprep.subr.mxu0 %v1054_v39 }
 0x46f   :  { %2130 = vmatpush3.msra.mxu0 %v1054_v39  ;;  %v1621_v39 = vld [vmem:[%s2929_s9 + $0x2] ss:$0 sm:$0xff] }
 0x470   :  { %2131 = vmatprep.subr.mxu0 %v1053_v40 }
 0x471   :  { %2132 = vmatpush3.msra.mxu0 %v1053_v40 }
 0x500   :  { %v674_v43 = vpop.f32.mrf.mxu0 }
 0x501   :  { %v675_v44 = vadd.f32 %v1611_v42, %v674_v43  ;;  %v1051_v42 = vld [vmem:[#allocation17 + $0x128] sm:$0xff]  ;;  %v1050_v43 = vld [vmem:[#allocation17 + $0x120] sm:$0xff] }
 0x502   :  { %v2009_v45 = vpop.f32.mrf.mxu0 }
 0x503   :  { %vm678_vm10 = vcmp.ge.f32.partialorder %v675_v44, 0.0  ;;  %v679_v46 = vmul.f32 0.01, %v675_v44  ;;  %v1048_v45 = vld [vmem:[#allocation17 + $0x110] sm:$0xff] }
 0x505   :  { %v680_v47 = vsel %vm678_vm10, %v675_v44, %v679_v46  ;;  %v1049_v44 = vld [vmem:[#allocation17 + $0x118] sm:$0xff]  ;;  %v1047_v46 = vld [vmem:[#allocation17 + $0x108] sm:$0xff]  ;;  %vm826_vm10 = vcmask 7168  }
 0x506   :  { %2043 = vmatmul.mubr.f32.vlgmr.msra.gmra.mxu1 %v680_v47  ;;  %v1046_v47 = vld [vmem:[#allocation17 + $0x100] sm:$0xff] }
 0x507   :  { %2081 = vmatpush3.msra.mxu1 %v955_v41  ;;  %v1052_v41 = vld [vmem:[#allocation17 + $0x130] sm:$0xff] }
 0x508   :  { %2082 = vmatprep.subr.mxu1 %v954_v48  ;;  %2133 = vmatprep.subr.mxu0 %v1052_v41 }
 0x509   :  { %2083 = vmatpush3.msra.mxu1 %v954_v48  ;;  %2134 = vmatpush3.msra.mxu0 %v1052_v41 }
 0x50a   :  { %2084 = vmatprep.subr.mxu1 %v953_v49  ;;  %2135 = vmatprep.subr.mxu0 %v1051_v42 }
 0x50b   :  { %2085 = vmatpush3.msra.mxu1 %v953_v49  ;;  %2136 = vmatpush3.msra.mxu0 %v1051_v42 }
 0x50c   :  { %2086 = vmatprep.subr.mxu1 %v952_v50  ;;  %2137 = vmatprep.subr.mxu0 %v1050_v43 }
 0x50d   :  { %2087 = vmatpush3.msra.mxu1 %v952_v50  ;;  %2138 = vmatpush3.msra.mxu0 %v1050_v43  ;;  %v1619_v50 = vld [vmem:[%s2929_s9 + $0x1] ss:$0 sm:$0xff] }
 0x50e   :  { %2088 = vmatprep.subr.mxu1 %v951_v51  ;;  %2139 = vmatprep.subr.mxu0 %v1049_v44 }
 0x50f   :  { %2089 = vmatpush3.msra.mxu1 %v951_v51  ;;  %2140 = vmatpush3.msra.mxu0 %v1049_v44 }
 0x510   :  { %2090 = vmatprep.subr.mxu1 %v950_v52  ;;  %2141 = vmatprep.subr.mxu0 %v1048_v45 }
 0x511   :  { %2091 = vmatpush3.msra.mxu1 %v950_v52  ;;  %2142 = vmatpush3.msra.mxu0 %v1048_v45 }
 0x512   :  { %2092 = vmatprep.subr.mxu1 %v949_v53  ;;  %2143 = vmatprep.subr.mxu0 %v1047_v46 }
 0x513   :  { %2093 = vmatpush3.msra.mxu1 %v949_v53  ;;  %2144 = vmatpush3.msra.mxu0 %v1047_v46 }
 0x514   :  { %2094 = vmatprep.subr.mxu1 %v948_v54  ;;  %2145 = vmatprep.subr.mxu0 %v1046_v47 }
 0x515   :  { %2095 = vmatpush3.msra.mxu1 %v948_v54  ;;  %2146 = vmatpush3.msra.mxu0 %v1046_v47 }
 0x516   :  { %2096 = vmatprep.subr.mxu1 %v947_v55  ;;  %2185 = vmatprep.subr.mxu0 %v2513_v1 }
 0x517   :  { %2097 = vmatpush3.msra.mxu1 %v947_v55 }
 0x518   :  { %2098 = vmatprep.subr.mxu1 %v946_v56 }
 0x519   :  { %2099 = vmatpush3.msra.mxu1 %v946_v56 }
 0x51a   :  { %2100 = vmatprep.subr.mxu1 %v945_v57 }
 0x51b   :  { %2101 = vmatpush3.msra.mxu1 %v945_v57 }
 0x51c   :  { %2102 = vmatprep.subr.mxu1 %v944_v59 }
 0x51d   :  { %2103 = vmatpush3.msra.mxu1 %v944_v59  ;;  %v1336_v59 = vld [vmem:[#allocation18 + $0xf8] sm:$0xff] }
 0x51e   :  { %2104 = vmatprep.subr.mxu1 %v943_v60 }
 0x51f   :  { %2105 = vmatpush3.msra.mxu1 %v943_v60 }
 0x520   :  { %v2079_v0 = vpop.f32.mrf.mxu0  ;;  %2106 = vmatprep.subr.mxu1 %v942_v61 }
 0x521   :  { %v930_v2 = vadd.f32 %v2079_v0, %v1616_v62  ;;  %2107 = vmatpush3.msra.mxu1 %v942_v61  ;;  %v1335_v61 = vld [vmem:[#allocation18 + $0xf0] sm:$0xff]  ;;  %v1332_v0 = vld [vmem:[#allocation18 + $0xd8] sm:$0xff] }
 0x522   :  { %v924_v4 = vpop.f32.mrf.mxu0  ;;  %2108 = vmatprep.subr.mxu1 %v941_v63 }
 0x523   :  { %v925_v5 = vadd.f32 %v1616_v62, %v924_v4  ;;  %2109 = vmatpush3.msra.mxu1 %v941_v63  ;;  %v936_v6 = vmul.f32 0.01, %v930_v2  ;;  %vm934_vm11 = vcmp.ge.f32.partialorder %v930_v2, 0.0  ;;  %v1334_v62 = vld [vmem:[#allocation18 + $0xe8] sm:$0xff]  ;;  %v1333_v63 = vld [vmem:[#allocation18 + $0xe0] sm:$0xff] }
 0x524   :  { %2110 = vmatprep.subr.mxu1 %v940_v3  ;;  %v1329_v4 = vld [vmem:[#allocation18 + $0xc0] sm:$0xff] }
 0x525   :  { %v935_v8 = vmul.f32 0.01, %v925_v5  ;;  %2111 = vmatpush3.msra.mxu1 %v940_v3  ;;  %vm933_vm12 = vcmp.ge.f32.partialorder %v925_v5, 0.0  ;;  %v938_v12 = vsel %vm934_vm11, %v930_v2, %v936_v6  ;;  %v1331_v2 = vld [vmem:[#allocation18 + $0xd0] sm:$0xff]  ;;  %v1330_v3 = vld [vmem:[#allocation18 + $0xc8] sm:$0xff] }
 0x526   :  { %2150 = vmatprep.subr.mxu1 %v2513_v1  ;;  %v1327_v6 = vld [vmem:[#allocation18 + $0xb0] sm:$0xff] }
 0x527   :  { %v937_v9 = vsel %vm933_vm12, %v925_v5, %v935_v8  ;;  %v1328_v5 = vld [vmem:[#allocation18 + $0xb8] sm:$0xff]  ;;  %v1326_v8 = vld [vmem:[#allocation18 + $0xa8] sm:$0xff] }
 0x528   :  { %2112 = vmatprep.mubr.f32.mxu1 %v937_v9  ;;  %v1325_v9 = vld [vmem:[#allocation18 + $0xa0] sm:$0xff] }
 0x529   :  { %2113 = vmatmul.mubr.f32.vlgmr.msra.gmra.mxu1 %v938_v12  ;;  %v1324_v12 = vld [vmem:[#allocation18 + $0x98] sm:$0xff] }
 0x52a   :  { %2151 = vmatpush3.msra.mxu1 %v1239_v10  ;;  %2182 = vmatprep.mubr.msk.f32.mxu1 %vm2514_vm0, %v2513_v1  ;;  %v1622_v10 = vld [vmem:[%s2931_s11] ss:$0 sm:$0xff] }
 0x52b   :  { %2152 = vmatprep.subr.mxu1 %v2513_v1 }
 0x52c   :  { %2153 = vmatpush3.msra.mxu1 %v1238_v13 }
 0x52d   :  { %2154 = vmatprep.subr.mxu1 %v2513_v1 }
 0x52e   :  { %2155 = vmatpush3.msra.mxu1 %v1237_v16 }
 0x52f   :  { %2156 = vmatprep.subr.mxu1 %v2513_v1 }
 0x530   :  { %2157 = vmatpush3.msra.mxu1 %v1236_v17  ;;  %v1323_v17 = vld [vmem:[#allocation18 + $0x90] sm:$0xff] }
 0x531   :  { %2158 = vmatprep.subr.mxu1 %v2513_v1 }
 0x532   :  { %2159 = vmatpush3.msra.mxu1 %v1235_v18 }
 0x533   :  { %2160 = vmatprep.subr.mxu1 %v2513_v1 }
 0x534   :  { %2161 = vmatpush3.msra.mxu1 %v1234_v20  ;;  %v1322_v20 = vld [vmem:[#allocation18 + $0x88] sm:$0xff] }
 0x535   :  { %2162 = vmatprep.subr.mxu1 %v2513_v1 }
 0x536   :  { %2163 = vmatpush3.msra.mxu1 %v1233_v21 }
 0x537   :  { %2164 = vmatprep.subr.mxu1 %v2513_v1 }
 0x538   :  { %2165 = vmatpush3.msra.mxu1 %v1232_v22  ;;  %v1321_v22 = vld [vmem:[#allocation18 + $0x80] sm:$0xff] }
 0x539   :  { %2166 = vmatprep.subr.mxu1 %v2513_v1 }
 0x53a   :  { %2167 = vmatpush3.msra.mxu1 %v1231_v23 }
 0x53b   :  { %2168 = vmatprep.subr.mxu1 %v2513_v1 }
 0x53c   :  { %2169 = vmatpush3.msra.mxu1 %v1230_v24  ;;  %v1434_v24 = vld [vmem:[#allocation18 + $0x178] sm:$0xff] }
 0x53d   :  { %2170 = vmatprep.subr.mxu1 %v2513_v1 }
 0x53e   :  { %2171 = vmatpush3.msra.mxu1 %v1229_v25  ;;  %v1433_v25 = vld [vmem:[#allocation18 + $0x170] sm:$0xff] }
 0x53f   :  { %2172 = vmatprep.subr.mxu1 %v2513_v1 }
 0x540   :  { %2173 = vmatpush3.msra.mxu1 %v1228_v26  ;;  %v1432_v26 = vld [vmem:[#allocation18 + $0x168] sm:$0xff] }
 0x541   :  { %2174 = vmatprep.subr.mxu1 %v2513_v1 }
 0x542   :  { %2175 = vmatpush3.msra.mxu1 %v1227_v27  ;;  %v1431_v27 = vld [vmem:[#allocation18 + $0x160] sm:$0xff] }
 0x543   :  { %2176 = vmatprep.subr.mxu1 %v2513_v1 }
 0x544   :  { %2177 = vmatpush3.msra.mxu1 %v1226_v19  ;;  %v1430_v19 = vld [vmem:[#allocation18 + $0x158] sm:$0xff] }
 0x545   :  { %2178 = vmatprep.subr.mxu1 %v2513_v1 }
 0x546   :  { %2179 = vmatpush3.msra.mxu1 %v1225_v28  ;;  %v1429_v28 = vld [vmem:[#allocation18 + $0x150] sm:$0xff] }
 0x547   :  { %2180 = vmatprep.subr.mxu1 %v2513_v1 }
 0x548   :  { %2181 = vmatpush3.msra.mxu1 %v1224_v30  ;;  %v1427_v30 = vld [vmem:[#allocation18 + $0x140] sm:$0xff] }
 0x549   :  { %2183 = vmatmul.mubr.msk.f32.vlgmr.msra.gmra.mxu1 %vm465_vm8, %v1222_v31  ;;  %2220 = vmatprep.subr.mxu1 %v2513_v1  ;;  %v1426_v31 = vld [vmem:[#allocation18 + $0x138] sm:$0xff] }
 0x54a   :  { %2252 = vmatprep.mubr.msk.f32.mxu1 %vm2514_vm0, %v2513_v1  ;;  %2221 = vmatpush3.msra.mxu1 %v1434_v24 }
 0x54b   :  { %2222 = vmatprep.subr.mxu1 %v2513_v1 }
 0x54c   :  { %2223 = vmatpush3.msra.mxu1 %v1433_v25  ;;  %v787_v25 = vmul.f32 -0.5, %v2699_v7 }
 0x54d   :  { %2224 = vmatprep.subr.mxu1 %v2513_v1 }
 0x54e   :  { %2225 = vmatpush3.msra.mxu1 %v1432_v26 }
 0x54f   :  { %2226 = vmatprep.subr.mxu1 %v2513_v1 }
 0x550   :  { %2227 = vmatpush3.msra.mxu1 %v1431_v27 }
 0x551   :  { %2228 = vmatprep.subr.mxu1 %v2513_v1 }
 0x552   :  { %2229 = vmatpush3.msra.mxu1 %v1430_v19 }
 0x553   :  { %2230 = vmatprep.subr.mxu1 %v2513_v1 }
 0x554   :  { %2231 = vmatpush3.msra.mxu1 %v1429_v28 }
 0x555   :  { %2232 = vmatprep.subr.mxu1 %v2513_v1 }
 0x556   :  { %2233 = vmatpush3.msra.mxu1 %v1428_v29 }
 0x557   :  { %2234 = vmatprep.subr.mxu1 %v2513_v1 }
 0x558   :  { %2235 = vmatpush3.msra.mxu1 %v1427_v30 }
 0x559   :  { %2236 = vmatprep.subr.mxu1 %v2513_v1 }
 0x55a   :  { %2237 = vmatpush3.msra.mxu1 %v1426_v31 }
 0x55b   :  { %2238 = vmatprep.subr.mxu1 %v2513_v1 }
 0x55c   :  { %2239 = vmatpush3.msra.mxu1 %v1425_v33 }
 0x55d   :  { %2240 = vmatprep.subr.mxu1 %v2513_v1 }
 0x55e   :  { %2241 = vmatpush3.msra.mxu1 %v1424_v34 }
 0x55f   :  { %2242 = vmatprep.subr.mxu1 %v2513_v1 }
 0x560   :  { %2243 = vmatpush3.msra.mxu1 %v1423_v35 }
 0x561   :  { %2244 = vmatprep.subr.mxu1 %v2513_v1 }
 0x562   :  { %2245 = vmatpush3.msra.mxu1 %v1422_v36 }
 0x563   :  { %2246 = vmatprep.subr.mxu1 %v2513_v1 }
 0x564   :  { %2247 = vmatpush3.msra.mxu1 %v1421_v14 }
 0x565   :  { %2248 = vmatprep.subr.mxu1 %v2513_v1 }
 0x566   :  { %2249 = vmatpush3.msra.mxu1 %v1420_v37 }
 0x567   :  { %2250 = vmatprep.subr.mxu1 %v2513_v1 }
 0x568   :  { %2251 = vmatpush3.msra.mxu1 %v1419_v38 }
 0x5c6   :  { %v2821_v48 = vpop.f32.mrf.mxu1 }
 0x5c8   :  { %v2044_v49 = vpop.f32.mrf.mxu1 }
 0x5e9   :  { %v2114_v51 = vpop.f32.mrf.mxu1 }
 0x5ea   :  { %v1036_v52 = vadd.f32 %v2114_v51, %v1619_v50 }
 0x5eb   :  { %v1030_v53 = vpop.f32.mrf.mxu1 }
 0x5ec   :  { %v1031_v54 = vadd.f32 %v1619_v50, %v1030_v53  ;;  %v1042_v55 = vmul.f32 0.01, %v1036_v52  ;;  %vm1040_vm13 = vcmp.ge.f32.partialorder %v1036_v52, 0.0  ;;  %v1627_v53 = vld [vmem:[%s2931_s11 + $0x2] ss:$0 sm:$0xff] }
 0x5ee   :  { %v1041_v56 = vmul.f32 0.01, %v1031_v54  ;;  %vm1039_vm14 = vcmp.ge.f32.partialorder %v1031_v54, 0.0  ;;  %v1044_v60 = vsel %vm1040_vm13, %v1036_v52, %v1042_v55 }
 0x5f0   :  { %v1043_v57 = vsel %vm1039_vm14, %v1031_v54, %v1041_v56 }
 0x5f1   :  { %2147 = vmatprep.mubr.f32.mxu0 %v1043_v57 }
 0x5f2   :  { %2148 = vmatmul.mubr.f32.vlgmr.msra.gmra.mxu0 %v1044_v60 }
 0x5f3   :  { %2186 = vmatpush3.msra.mxu0 %v1336_v59  ;;  %2217 = vmatprep.mubr.msk.f32.mxu0 %vm2514_vm0, %v2513_v1 }
 0x5f4   :  { %2187 = vmatprep.subr.mxu0 %v2513_v1 }
 0x5f5   :  { %2188 = vmatpush3.msra.mxu0 %v1335_v61 }
 0x5f6   :  { %2189 = vmatprep.subr.mxu0 %v2513_v1 }
 0x5f7   :  { %2190 = vmatpush3.msra.mxu0 %v1334_v62 }
 0x5f8   :  { %2191 = vmatprep.subr.mxu0 %v2513_v1 }
 0x5f9   :  { %2192 = vmatpush3.msra.mxu0 %v1333_v63 }
 0x5fa   :  { %2193 = vmatprep.subr.mxu0 %v2513_v1 }
 0x5fb   :  { %2194 = vmatpush3.msra.mxu0 %v1332_v0 }
 0x5fc   :  { %2195 = vmatprep.subr.mxu0 %v2513_v1 }
 0x5fd   :  { %2196 = vmatpush3.msra.mxu0 %v1331_v2 }
 0x5fe   :  { %2197 = vmatprep.subr.mxu0 %v2513_v1 }
 0x5ff   :  { %2198 = vmatpush3.msra.mxu0 %v1330_v3 }
 0x600   :  { %2199 = vmatprep.subr.mxu0 %v2513_v1 }
 0x601   :  { %2200 = vmatpush3.msra.mxu0 %v1329_v4 }
 0x602   :  { %2201 = vmatprep.subr.mxu0 %v2513_v1 }
 0x603   :  { %2202 = vmatpush3.msra.mxu0 %v1328_v5 }
 0x604   :  { %2203 = vmatprep.subr.mxu0 %v2513_v1 }
 0x605   :  { %2204 = vmatpush3.msra.mxu0 %v1327_v6 }
 0x606   :  { %2205 = vmatprep.subr.mxu0 %v2513_v1 }
 0x607   :  { %2206 = vmatpush3.msra.mxu0 %v1326_v8 }
 0x608   :  { %2207 = vmatprep.subr.mxu0 %v2513_v1 }
 0x609   :  { %2208 = vmatpush3.msra.mxu0 %v1325_v9  ;;  %v1313_v13 = vpop.f32.mrf.mxu1 }
 0x60a   :  { %v1314_v16 = vadd.f32 %v1622_v10, %v1313_v13  ;;  %2209 = vmatprep.subr.mxu0 %v2513_v1  ;;  %v789_v13 = vmul.f32 %v2699_v7, %v2699_v7 }
 0x60b   :  { %2210 = vmatpush3.msra.mxu0 %v1324_v12  ;;  %v2184_v18 = vpop.f32.mrf.mxu1 }
 0x60c   :  { %2211 = vmatprep.subr.mxu0 %v2513_v1  ;;  %v1318_v21 = vmul.f32 0.01, %v1314_v16  ;;  %vm1317_vm15 = vcmp.ge.f32.partialorder %v1314_v16, 0.0 }
 0x60d   :  { %2212 = vmatpush3.msra.mxu0 %v1323_v17 }
 0x60e   :  { %2213 = vmatprep.subr.mxu0 %v2513_v1  ;;  %v1319_v23 = vsel %vm1317_vm15, %v1314_v16, %v1318_v21 }
 0x60f   :  { %2214 = vmatpush3.msra.mxu0 %v1322_v20 }
 0x610   :  { %2215 = vmatprep.subr.mxu0 %v2513_v1  ;;  %v1625_v1 = vld [vmem:[%s2931_s11 + $0x1] ss:$0 sm:$0xff]  ;;  %s2518_s11 = smov 2  }
 0x611   :  { %2216 = vmatpush3.msra.mxu0 %v1321_v22  ;;  %v788_v22 = vmul.f32 %v2702_v11, %v2702_v11 }
 0x612   :  { %2218 = vmatmul.mubr.f32.vlgmr.msra.gmra.mxu0 %v1319_v23 }
 0x6b2   :  { %v2149_v40 = vpop.f32.mrf.mxu0 }
 0x6b3   :  { %v1142_v41 = vadd.f32 %v2149_v40, %v1621_v39 }
 0x6b4   :  { %v1136_v42 = vpop.f32.mrf.mxu0 }
 0x6b5   :  { %v1148_v43 = vmul.f32 0.01, %v1142_v41  ;;  %v1137_v44 = vadd.f32 %v1621_v39, %v1136_v42  ;;  %vm1146_vm0 = vcmp.ge.f32.partialorder %v1142_v41, 0.0 }
 0x6b7   :  { %v2864_v45 = vsel %vm1146_vm0, %v1142_v41, %v1148_v43  ;;  %v1147_v4 = vmul.f32 0.01, %v1137_v44  ;;  %vm1145_vm4 = vcmp.ge.f32.partialorder %v1137_v44, 0.0 }
 0x6b8   :  { %v1190_v46 = vsel %vm1168_vm1, %v2864_v45, -inf }
 0x6b9   :  { %1191 = vmax.xlane.f32.xlu1 %v1190_v46  ;;  %v2877_v8 = vsel %vm1145_vm4, %v1137_v44, %v1147_v4  ;;  %v1613_v46 = vld [vmem:[%s2927_s7 + $0x2] ss:$0 sm:$0xff]  ;;  %s2521_s7 = smov 1  }
 0x6ba   :  { %v1169_v9 = vsel %vm1168_vm1, %v2877_v8, -inf }
 0x6d2   :  { %v1411_v47 = vpop.f32.mrf.mxu0 }
 0x6d3   :  { %v1412_v49 = vadd.f32 %v1625_v1, %v1411_v47  ;;  %v773_v1 = vadd.f32 %v1613_v46, %v2821_v48 }
 0x6d4   :  { %v2219_v50 = vpop.f32.mrf.mxu0 }
 0x6d5   :  { %vm1415_vm2 = vcmp.ge.f32.partialorder %v1412_v49, 0.0  ;;  %v1416_v51 = vmul.f32 0.01, %v1412_v49  ;;  %v777_v47 = vmul.f32 0.01, %v773_v1  ;;  %vm776_vm7 = vcmp.ge.f32.partialorder %v773_v1, 0.0 }
 0x6d7   :  { %v1417_v52 = vsel %vm1415_vm2, %v1412_v49, %v1416_v51 }
 0x6d8   :  { %2253 = vmatmul.mubr.f32.vlgmr.msra.gmra.mxu1 %v1417_v52 }
 0x742   :  { %v1192_v61 = vpop.xlane.xlu1 %1191 }
 0x743   :  { %v1193_v0 = vsub.f32 %v2864_v45, %v1192_v61 }
 0x745   :  { %v1194_v3 = vmul.f32 1.442695, %v1193_v0 }
 0x798   :  { %v1509_v54 = vpop.f32.mrf.mxu1 }
 0x799   :  { %v1510_v55 = vadd.f32 %v1627_v53, %v1509_v54 }
 0x79a   :  { %v2254_v56 = vpop.f32.mrf.mxu1 }
 0x79b   :  { %vm1513_vm3 = vcmp.ge.f32.partialorder %v1510_v55, 0.0  ;;  %v1514_v57 = vmul.f32 0.01, %v1510_v55 }
 0x79d   :  { %v1515_v59 = vsel %vm1513_vm3, %v1510_v55, %v1514_v57 }
 0x79e   :  { %v1516_v60 = vsel %vm1168_vm1, %v1515_v59, -inf  ;;  %1549 = vst [vmem:[#allocation20] sm:$0xff] %v1515_v59 }
 0x79f   :  { %1517 = vmax.xlane.f32.xlu0 %v1516_v60 }
 0x828   :  { %v1518_v62 = vpop.xlane.xlu0 %1517 }
 0x829   :  { %v1519_v63 = vsub.f32 %v1515_v59, %v1518_v62 }
 0x82b   :  { %v1520_v2 = vmul.f32 1.442695, %v1519_v63 }
 0x82d   :  { %2287 = vpow2.f32 %v1520_v2 }
 0x82e   :  { %2289 = vpow2.f32 %v1194_v3 }
 0x83a   :  { %v2288_v5 = vpop.eup %2287 }
 0x83b   :  { %v1522_v6 = vsel %vm1168_vm1, %v2288_v5, 0.0  ;;  %v2290_v10 = vpop.eup %2289 }
 0x83c   :  { %1523 = vadd.xlane.f32.xlu1 %v1522_v6  ;;  %v1196_v12 = vsel %vm1168_vm1, %v2290_v10, 0.0 }
 0x840   :  { %1170 = vmax.xlane.f32.xlu1 %v1169_v9 }
 0x844   :  { %1197 = vadd.xlane.f32.xlu1 %v1196_v12 }
 0x855   :  { %791 = vrot.lane.b32.xlu1 %v789_v13, %s2506_s17  ;;  %s2519_s17 = smov 127  }
 0x8c5   :  { %v1524_v16 = vpop.xlane.xlu1 %1523 }
 0x8c6   :  { %2291 = vlog2.f32 %v1524_v16 }
 0x8c9   :  { %v1171_v17 = vpop.xlane.xlu1 %1170 }
 0x8ca   :  { %v1172_v18 = vsub.f32 %v2877_v8, %v1171_v17 }
 0x8cc   :  { %v1173_v20 = vmul.f32 1.442695, %v1172_v18 }
 0x8cd   :  { %v1198_v21 = vpop.xlane.xlu1 %1197 }
 0x8ce   :  { %2293 = vpow2.f32 %v1173_v20 }
 0x8cf   :  { %2295 = vlog2.f32 %v1198_v21 }
 0x8d1   :  { %v792_v23 = vpop.permute.xlu1 %791 }
 0x8d2   :  { %v794_v24 = vadd.f32 %v792_v23, %v788_v22 }
 0x8d3   :  { %v2292_v26 = vpop.eup %2291 }
 0x8d4   :  { %v1526_v27 = vmul.f32 0.6931472, %v2292_v26  ;;  %v795_v19 = vmul.f32 0.5, %v794_v24 }
 0x8d6   :  { %v1527_v28 = vadd.f32 %v1526_v27, %v1518_v62  ;;  %v796_v29 = vadd.f32 %v795_v19, %v787_v25 }
 0x8d8   :  { %v1528_v30 = vsub.f32 %v1515_v59, %v1527_v28  ;;  %v1615_v31 = vadd.f32 -0.5, %v796_v29 }
 0x8da   :  { %1530 = vrot.lane.b32.xlu1 %v1528_v30, %s2518_s11 }
 0x8db   :  { %v2294_v33 = vpop.eup %2293 }
 0x8dc   :  { %v2296_v34 = vpop.eup %2295  ;;  %v1175_v35 = vsel %vm1168_vm1, %v2294_v33, 0.0 }
 0x8dd   :  { %v1200_v36 = vmul.f32 0.6931472, %v2296_v34  ;;  %1176 = vadd.xlane.f32.xlu0 %v1175_v35 }
 0x8de   :  { %799 = vrot.lane.b32.xlu1 %v1615_v31, %s2516_s28  ;;  %s2520_s28 = smov 126  }
 0x8df   :  { %v1201_v11 = vadd.f32 %v1200_v36, %v1192_v61 }
 0x8e1   :  { %v1202_v14 = vsub.f32 %v1201_v11, %v2864_v45  ;;  %v778_v45 = vsel %vm776_vm7, %v773_v1, %v777_v47 }
 0x8e2   :  { %v779_v49 = vsub.f32 %v2661_v32, %v778_v45 }
 0x8e3   :  { %v1204_v37 = vsel %vm1203_vm5, %v1202_v14, 0.0 }
 0x8e4   :  { %v1205_v38 = vrot.slane %v1204_v37, 4  ;;  %v780_v50 = vmul.f32 -0.5, %v779_v49 }
 0x8e6   :  { %v1206_v39 = vadd.f32 %v1205_v38, %v1204_v37  ;;  %v781_v51 = vmul.f32 %v780_v50, %v779_v49 }
 0x8e8   :  { %v1207_v40 = vrot.slane %v1206_v39, 2  ;;  %v1614_v52 = vadd.f32 -0.9189385, %v781_v51 }
 0x8ea   :  { %v1208_v41 = vadd.f32 %v1207_v40, %v1206_v39  ;;  %v784_v53 = vsel %vm783_vm9, %v1614_v52, 0.0 }
 0x8ec   :  { %v1209_v42 = vrot.slane %v1208_v41, 1 }
 0x8ee   :  { %v1210_v43 = vadd.f32 %v1209_v42, %v1208_v41 }
 0x8f0   :  { %v1211_v44 = vmul.f32 0.125, %v1210_v43 }
 0x8f2   :  { %1213 = vrot.lane.b32.xlu1 %v1211_v44, %s2519_s17 }
 0x916   :  { %785 = vadd.xlane.f32.xlu1 %v784_v53 }
 0x94c   :  { %v1531_v54 = vpop.permute.xlu1 %1530 }
 0x94d   :  { %v1533_v55 = vmul.f32 %v1531_v54, %v2690_v58 }
 0x94f   :  { %1535 = vrot.lane.b32.xlu0 %v1533_v55, %s2520_s28 }
 0x950   :  { %v800_v57 = vpop.permute.xlu1 %799 }
 0x951   :  { %v802_v48 = vsel %vm2710_vm6, %v800_v57, 0.0 }
 0x952   :  { %v803_v59 = vsel %vm465_vm8, %v802_v48, 0.0 }
 0x964   :  { %v1214_v15 = vpop.permute.xlu1 %1213 }
 0x966   :  { %v1177_v56 = vpop.xlane.xlu0 %1176 }
 0x967   :  { %2297 = vlog2.f32 %v1177_v56 }
 0x96e   :  { %804 = vadd.xlane.f32.xlu0 %v803_v59 }
 0x974   :  { %v2298_v32 = vpop.eup %2297 }
 0x975   :  { %v1179_v60 = vmul.f32 0.6931472, %v2298_v32 }
 0x977   :  { %v1180_v61 = vadd.f32 %v1179_v60, %v1171_v17 }
 0x979   :  { %v1181_v62 = vsub.f32 %v1180_v61, %v2877_v8 }
 0x97b   :  { %v1182_v63 = vsel %vm826_vm10, %v1181_v62, 0.0 }
 0x97c   :  { %v1183_v0 = vrot.slane %v1182_v63, 4 }
 0x97e   :  { %v1184_v2 = vadd.f32 %v1183_v0, %v1182_v63 }
 0x980   :  { %v1185_v3 = vrot.slane %v1184_v2, 2 }
 0x982   :  { %v1186_v4 = vadd.f32 %v1185_v3, %v1184_v2 }
 0x984   :  { %v1187_v5 = vrot.slane %v1186_v4, 1 }
 0x986   :  { %v1188_v6 = vadd.f32 %v1187_v5, %v1186_v4 }
 0x988   :  { %v1189_v9 = vmul.f32 0.125, %v1188_v6 }
 0x98a   :  { %v1216_v10 = vadd.f32 %v1214_v15, %v1189_v9 }
 0x98c   :  { %v1217_v12 = vmul.f32 0.5, %v1216_v10 }
 0x98e   :  { %1553 = vrot.lane.b32.xlu0 %v1217_v12, %s2521_s7 }
 0x9c1   :  { %v1536_v13 = vpop.permute.xlu0 %1535 }
 0x9c2   :  { %v1538_v16 = vsel %vm1168_vm1, %v1536_v13, 0.0 }
 0x9c3   :  { %1539 = vadd.xlane.f32.xlu1 %v1538_v16 }
 0x9d4   :  { %1152 = vrot.lane.b32.xlu1 %v2877_v8, %s2519_s17 }
 0x9d5   :  { %2450 = shalt.err (!%p2447_p7)
}
 0x9d6   :  { %1569 = dma.vmem_to_hbm [thread:$0]  %s1567_s29, 128, %s2932_s12, [#allocation7]   ;;  %v818_v17 = vand.u32 2147483647, %v2699_v7  ;;  %v815_v23 = vmax.f32 %v2699_v7, 0.0  ;;  %v816_v24 = vmul.f32 %v2699_v7, %v2690_v58  ;;  %v786_v28 = vpop.xlane.xlu1 %785  ;;  %vm1550_vm6 = vcmask 0  }
 0x9d7   :  { %s2523_s12 = smov [#allocation21]   ;;  %vm1556_vm8 = vcmask 8200   ;;  %vm1558_vm11 = vcmask 16400  }
 0x9d8   :  { %v819_v18 = vsub.f32 0.0, %v818_v17  ;;  %v817_v27 = vsub.f32 %v815_v23, %v816_v24  ;;  %s1576_s1 = sshll.u32 %s2523_s12, 4  ;;  %s1577_s1 = int_to_ptr.vmem [resolvable:$true] %s1576_s1 }
 0x9d9   :  { %s2459_s14 = scalar_lea.vmem %s1577_s1, 16  ;;  %s2463_s15 = scalar_lea.vmem %s1577_s1, 32 }
 0x9da   :  { %v820_v20 = vmul.f32 1.442695, %v819_v18  ;;  %p2460_p8 = scmp.ne.s32.totalorder %s1577_s1, %s2459_s14  ;;  %p2464_p9 = scmp.lt.s32.totalorder %s1577_s1, %s1577_s1 }
 0x9db   :  { %p2465_p10 = scmp.lt.s32.totalorder %s2463_s15, %s2459_s14 }
 0x9dc   :  { %2299 = vpow2.f32 %v820_v20 }
 0x9dd   :  { %p2466_p11 = por %p2465_p10, %p2464_p9 }
 0x9df   :  { %p2467_p12 = pnand %p2466_p11, %p2460_p8 }
 0x9e9   :  { %v2300_v21 = vpop.eup %2299 }
 0x9ea   :  { %v822_v22 = vadd.f32 1.0, %v2300_v21 }
 0x9ec   :  { %2301 = vlog2.f32 %v822_v22 }
 0x9f7   :  { %v805_v26 = vpop.xlane.xlu0 %804 }
 0x9f8   :  { %v806_v29 = vsub.f32 %v786_v28, %v805_v26 }
 0x9f9   :  { %v2302_v25 = vpop.eup %2301 }
 0x9fa   :  { %v824_v19 = vmul.f32 0.6931472, %v2302_v25  ;;  %v807_v31 = vrot.slane %v806_v29, 4 }
 0x9fc   :  { %v825_v30 = vadd.f32 %v824_v19, %v817_v27  ;;  %v808_v34 = vadd.f32 %v807_v31, %v806_v29 }
 0x9fe   :  { %v827_v33 = vsel %vm826_vm10, %v825_v30, 0.0  ;;  %v809_v14 = vrot.slane %v808_v34, 2 }
 0x9ff   :  { %v828_v35 = vrot.slane %v827_v33, 4 }
 0xa00   :  { %v810_v7 = vadd.f32 %v809_v14, %v808_v34  ;;  %v1554_v63 = vpop.permute.xlu0 %1553 }
 0xa01   :  { %v829_v37 = vadd.f32 %v828_v35, %v827_v33 }
 0xa02   :  { %v811_v44 = vrot.slane %v810_v7, 1 }
 0xa03   :  { %v830_v40 = vrot.slane %v829_v37, 2 }
 0xa04   :  { %v812_v49 = vadd.f32 %v811_v44, %v810_v7 }
 0xa05   :  { %v831_v1 = vadd.f32 %v830_v40, %v829_v37 }
 0xa06   :  { %v814_v54 = vmul.f32 0.125, %v812_v49 }
 0xa07   :  { %v832_v51 = vrot.slane %v831_v1, 1 }
 0xa08   :  { %v1164_v48 = vmul.f32 -1.0, %v814_v54 }
 0xa09   :  { %v833_v56 = vadd.f32 %v832_v51, %v831_v1 }
 0xa0b   :  { %v834_v32 = vmul.f32 0.125, %v833_v56 }
 0xa4c   :  { %v1540_v36 = vpop.xlane.xlu1 %1539 }
 0xa4d   :  { %v1541_v11 = vsub.f32 0.0, %v1540_v36 }
 0xa4f   :  { %v1542_v38 = vrot.slane %v1541_v11, 4 }
 0xa50   :  { %v1153_v39 = vpop.permute.xlu1 %1152 }
 0xa51   :  { %v1155_v58 = vsub.f32 %v2877_v8, %v1153_v39  ;;  %v1543_v42 = vadd.f32 %v1542_v38, %v1541_v11 }
 0xa53   :  { %v1156_v41 = vsel %vm826_vm10, %v1155_v58, 0.0  ;;  %v1544_v47 = vrot.slane %v1543_v42, 2 }
 0xa54   :  { %v1157_v43 = vrot.slane %v1156_v41, 4 }
 0xa55   :  { %v1545_v52 = vadd.f32 %v1544_v47, %v1543_v42 }
 0xa56   :  { %v1158_v46 = vadd.f32 %v1157_v43, %v1156_v41 }
 0xa57   :  { %v1546_v8 = vrot.slane %v1545_v52, 1 }
 0xa58   :  { %v1159_v45 = vrot.slane %v1158_v46, 2 }
 0xa59   :  { %v1547_v61 = vadd.f32 %v1546_v8, %v1545_v52 }
 0xa5a   :  { %v1160_v50 = vadd.f32 %v1159_v45, %v1158_v46 }
 0xa5b   :  { %v1548_v0 = vmul.f32 0.125, %v1547_v61 }
 0xa5c   :  { %v1161_v53 = vrot.slane %v1160_v50, 1 }
 0xa5e   :  { %v1162_v55 = vadd.f32 %v1161_v53, %v1160_v50 }
 0xa60   :  { %v1163_v57 = vmul.f32 0.125, %v1162_v55 }
 0xa62   :  { %v1165_v59 = vmul.f32 10.0, %v1163_v57 }
 0xa64   :  { %v1166_v60 = vadd.f32 %v1165_v59, %v1164_v48 }
 0xa66   :  { %v1167_v62 = vadd.f32 %v1166_v60, %v834_v32 }
 0xa68   :  { %1551 = vst.msk [vmem:[#allocation21] sm:$0x1] %vm1550_vm6, %v1167_v62 }
 0xa69   :  { %1557 = vst.msk [vmem:[#allocation21] sm:$0x1] %vm1556_vm8, %v1554_v63 }
 0xa6a   :  { %1559 = vst.msk [vmem:[#allocation21] sm:$0x1] %vm1558_vm11, %v1548_v0 }
 0xa6b   :  { %2470 = shalt.err (!%p2467_p12)
}
 0xa6c   :  { %1579 = dma.vmem_to_hbm [thread:$0]  %s1577_s1, 16, %s2933_s13, [#allocation22]  }
 0xa6d   :  { %2495 = dma.done.wait [#allocation7], 128  }
 0xa6e   :  { %2496 = vsyncadd [#allocation7], 4294967168 }
 0xa6f   :  { %2497 = dma.done.wait [#allocation22], 16  }
 0xa70   :  { %2498 = vsyncadd [#allocation22], 4294967280 }
 0xa71   :  { %1586 = vsyncpa [#allocation6], 1 }
 0xa72   :  { %1587 = vsyncpa [#allocation13], 1 }
 0xa73   :  { %1588 = vsyncpa [#allocation16], 1 }
 0xa74   :  { %1589 = vsyncpa [#allocation19], 1 }
 0xa75   :  { %1590 = vsyncpa [#allocation7], 1 }
 0xa76   :  { %1591 = vsyncpa [#allocation22], 1 }
 0xa77   :  { %1592 = vsyncpa [#allocation8], 1 }
 0xa78   :  { %1593 = vsyncpa [#allocation10], 1 }

</bundles_post_ra>
